<compile_context>
chip_gen: v5e
topology: v5e:2x2
jax: 0.10.0
libtpu: 0.0.40
codegen_flags: <defaults>
</compile_context>

<pallas_src>
import jax
import jax.numpy as jnp
from jax import lax
from jax.experimental import pallas as pl
from jax.experimental.pallas import tpu as pltpu


def _gau_kernel(zf_ref, xf_ref, wq_ref, ws_ref, wg_ref, bg_ref,
                wfe_ref, wfg_ref, bf_ref, out_ref):
    zf = zf_ref[0]                      # (Sz, C)
    xf = xf_ref[0]                      # (Sx, C)

    # 1x1 convs (no bias) -> MXU matmuls
    xf_trans = jnp.dot(xf, wq_ref[...], preferred_element_type=jnp.float32)
    zf_trans = jnp.dot(zf, ws_ref[...], preferred_element_type=jnp.float32)

    # g(.) = conv1x1 + folded BN + ReLU, shared for zf and xf
    xf_g = jnp.maximum(
        jnp.dot(xf, wg_ref[...], preferred_element_type=jnp.float32)
        + bg_ref[...], 0.0)
    zf_g = jnp.maximum(
        jnp.dot(zf, wg_ref[...], preferred_element_type=jnp.float32)
        + bg_ref[...], 0.0)

    # similarity: contract channel dim of both operands (xf_trans @ zf_trans^T)
    sim = lax.dot_general(xf_trans, zf_trans,
                          (((1,), (1,)), ((), ())),
                          preferred_element_type=jnp.float32)   # (Sx, Sz)

    # softmax over the template axis (last dim)
    m = jnp.max(sim, axis=-1, keepdims=True)
    p = jnp.exp(sim - m)                                        # EUP
    denom = jnp.sum(p, axis=-1, keepdims=True)                  # XLU reduce
    attn = p / denom

    # embedding = attn @ zf_g
    emb = jnp.dot(attn, zf_g, preferred_element_type=jnp.float32)  # (Sx, C)

    # fi(cat([embedding, xf_g])) == emb @ Wfi[:C] + xf_g @ Wfi[C:] + b, ReLU
    out = (jnp.dot(emb, wfe_ref[...], preferred_element_type=jnp.float32)
           + jnp.dot(xf_g, wfg_ref[...], preferred_element_type=jnp.float32)
           + bf_ref[...])
    out_ref[0] = jnp.maximum(out, 0.0).astype(out_ref.dtype)


def graph_attention_union(zf, xf, params):
    """zf: (N, Hz, Wz, C) template feats, xf: (N, Hx, Wx, C) search feats."""
    N, Hz, Wz, C = zf.shape
    _, Hx, Wx, _ = xf.shape
    Sz, Sx = Hz * Wz, Hx * Wx
    wq, ws, wg, bg, wfe, wfg, bf = params
    Co = wfe.shape[1]

    zf2 = zf.reshape(N, Sz, C)          # lane-dense: C on the lane axis
    xf2 = xf.reshape(N, Sx, C)

    out = pl.pallas_call(
        _gau_kernel,
        out_shape=jax.ShapeDtypeStruct((N, Sx, Co), jnp.float32),
        grid_spec=pltpu.PrefetchScalarGridSpec(
            num_scalar_prefetch=0,
            grid=(N,),
            in_specs=[
                pl.BlockSpec((1, Sz, C), lambda n: (n, 0, 0)),   # zf
                pl.BlockSpec((1, Sx, C), lambda n: (n, 0, 0)),   # xf
                pl.BlockSpec((C, C), lambda n: (0, 0)),          # w_query
                pl.BlockSpec((C, C), lambda n: (0, 0)),          # w_support
                pl.BlockSpec((C, C), lambda n: (0, 0)),          # w_g (BN folded)
                pl.BlockSpec((1, C), lambda n: (0, 0)),          # b_g
                pl.BlockSpec((C, Co), lambda n: (0, 0)),         # w_fi[:C]
                pl.BlockSpec((C, Co), lambda n: (0, 0)),         # w_fi[C:]
                pl.BlockSpec((1, Co), lambda n: (0, 0)),         # b_fi
            ],
            out_specs=pl.BlockSpec((1, Sx, Co), lambda n: (n, 0, 0))),
        compiler_params=pltpu.CompilerParams(
            # batch elements are independent -> shard over v7x's 2 TCs
            dimension_semantics=("parallel",)),
    )(zf2, xf2, wq, ws, wg, bg, wfe, wfg, bf)
    return out.reshape(N, Hx, Wx, Co)


def _fold_bn(w, b, gamma, beta, mean, var, eps=1e-5):
    # w: (Cin, Cout), per-output-channel BN fold
    scale = gamma / jnp.sqrt(var + eps)
    return w * scale[None, :], (b - mean) * scale + beta


def init_params(key, C, Co):
    ks = jax.random.split(key, 8)

    def conv_w(k, shape, scale=0.05):
        return scale * jax.random.normal(k, shape, jnp.float32)

    def bn(k, ch):
        k1, k2, k3, k4 = jax.random.split(k, 4)
        gamma = 1.0 + 0.1 * jax.random.normal(k1, (ch,), jnp.float32)
        beta = 0.1 * jax.random.normal(k2, (ch,), jnp.float32)
        mean = 0.1 * jax.random.normal(k3, (ch,), jnp.float32)
        var = 1.0 + 0.1 * jax.random.uniform(k4, (ch,), jnp.float32)
        return gamma, beta, mean, var

    wq = conv_w(ks[0], (C, C))                     # query  1x1, no bias
    ws = conv_w(ks[1], (C, C))                     # support 1x1, no bias

    # g: conv1x1(C->C, bias) + BN + ReLU
    wg_raw = conv_w(ks[2], (C, C))
    bg_raw = 0.1 * jax.random.normal(ks[3], (C,), jnp.float32)
    wg, bg = _fold_bn(wg_raw, bg_raw, *bn(ks[4], C))

    # fi: conv1x1(2C->Co, bias) + BN + ReLU; split weight into the
    # [embedding | xf_g] halves so the kernel never materializes the concat.
    wf_raw = conv_w(ks[5], (2 * C, Co))
    bf_raw = 0.1 * jax.random.normal(ks[6], (Co,), jnp.float32)
    wf, bf = _fold_bn(wf_raw, bf_raw, *bn(ks[7], Co))
    wfe, wfg = wf[:C], wf[C:]

    return (wq, ws, wg, bg.reshape(1, C), wfe, wfg, bf.reshape(1, Co))


def reference(zf, xf, params):
    """Pure-JAX mirror of Graph_Attention_Union.forward (BN folded, NHWC)."""
    wq, ws, wg, bg, wfe, wfg, bf = params
    N, Hz, Wz, C = zf.shape
    _, Hx, Wx, _ = xf.shape
    zf2 = zf.reshape(N, Hz * Wz, C)
    xf2 = xf.reshape(N, Hx * Wx, C)

    xf_trans = jnp.einsum('nsc,cd->nsd', xf2, wq)
    zf_trans = jnp.einsum('nzc,cd->nzd', zf2, ws)
    xf_g = jax.nn.relu(jnp.einsum('nsc,cd->nsd', xf2, wg) + bg)
    zf_g = jax.nn.relu(jnp.einsum('nzc,cd->nzd', zf2, wg) + bg)

    sim = jnp.einsum('nsd,nzd->nsz', xf_trans, zf_trans)
    attn = jax.nn.softmax(sim, axis=-1)
    emb = jnp.einsum('nsz,nzc->nsc', attn, zf_g)

    out = jax.nn.relu(jnp.einsum('nsc,cd->nsd', emb, wfe)
                      + jnp.einsum('nsc,cd->nsd', xf_g, wfg) + bf)
    return out.reshape(N, Hx, Wx, -1)


if __name__ == "__main__":
    key = jax.random.PRNGKey(0)
    kz, kx, kp = jax.random.split(key, 3)

    N = 2
    C = 128          # in_channel  (lane-dense: channel dim == 128 lanes)
    Co = 128         # out_channel
    Hz = Wz = 8      # template spatial  -> Sz = 64
    Hx = Wx = 16     # search spatial    -> Sx = 256

    zf = jax.random.normal(kz, (N, Hz, Wz, C), jnp.float32)
    xf = jax.random.normal(kx, (N, Hx, Wx, C), jnp.float32)
    params = init_params(kp, C, Co)

    out = jax.block_until_ready(graph_attention_union(zf, xf, params))

    ref = reference(zf, xf, params)
    assert out.shape == (N, Hx, Wx, Co)
    assert jnp.allclose(out, ref, atol=1e-4, rtol=1e-4), (
        f"mismatch vs reference, max abs err = {jnp.max(jnp.abs(out - ref))}")
    print("KERNEL_OK")
</pallas_src>

<mosaic_0001>
module attributes {stable_mosaic.version = 11 : i64} {
  func.func @_gau_kernel(%arg0: i32, %arg1: memref<1x64x128xf32, #tpu.memory_space<vmem>>, %arg2: memref<1x256x128xf32, #tpu.memory_space<vmem>>, %arg3: memref<128x128xf32, #tpu.memory_space<vmem>>, %arg4: memref<128x128xf32, #tpu.memory_space<vmem>>, %arg5: memref<128x128xf32, #tpu.memory_space<vmem>>, %arg6: memref<1x128xf32, #tpu.memory_space<vmem>>, %arg7: memref<128x128xf32, #tpu.memory_space<vmem>>, %arg8: memref<128x128xf32, #tpu.memory_space<vmem>>, %arg9: memref<1x128xf32, #tpu.memory_space<vmem>>, %arg10: memref<1x256x128xf32, #tpu.memory_space<vmem>>) attributes {dimension_semantics = [#tpu.dimension_semantics<parallel>], iteration_bounds = array<i64: 2>, scalar_prefetch = 0 : i64, scratch_operands = 0 : i64, tpu.core_type = #tpu.core_type<tc>, window_params = [{transform_indices = @transform_0, window_bounds = array<i64: 1, 64, 128>}, {transform_indices = @transform_1, window_bounds = array<i64: 1, 256, 128>}, {pipeline_mode = #tpu.pipeline_mode<synchronous>, transform_indices = @transform_2, window_bounds = array<i64: 128, 128>}, {pipeline_mode = #tpu.pipeline_mode<synchronous>, transform_indices = @transform_3, window_bounds = array<i64: 128, 128>}, {pipeline_mode = #tpu.pipeline_mode<synchronous>, transform_indices = @transform_4, window_bounds = array<i64: 128, 128>}, {pipeline_mode = #tpu.pipeline_mode<synchronous>, transform_indices = @transform_5, window_bounds = array<i64: 1, 128>}, {pipeline_mode = #tpu.pipeline_mode<synchronous>, transform_indices = @transform_6, window_bounds = array<i64: 128, 128>}, {pipeline_mode = #tpu.pipeline_mode<synchronous>, transform_indices = @transform_7, window_bounds = array<i64: 128, 128>}, {pipeline_mode = #tpu.pipeline_mode<synchronous>, transform_indices = @transform_8, window_bounds = array<i64: 1, 128>}, {transform_indices = @transform_9, window_bounds = array<i64: 1, 256, 128>}]} {
    %c0 = arith.constant 0 : index
    %c0_0 = arith.constant 0 : index
    %c0_1 = arith.constant 0 : index
    %0 = vector.load %arg1[%c0, %c0_0, %c0_1] : memref<1x64x128xf32, #tpu.memory_space<vmem>>, vector<1x64x128xf32>
    %1 = vector.shape_cast %0 : vector<1x64x128xf32> to vector<64x128xf32>
    %c0_2 = arith.constant 0 : index
    %c0_3 = arith.constant 0 : index
    %c0_4 = arith.constant 0 : index
    %2 = vector.load %arg2[%c0_2, %c0_3, %c0_4] : memref<1x256x128xf32, #tpu.memory_space<vmem>>, vector<1x256x128xf32>
    %3 = vector.shape_cast %2 : vector<1x256x128xf32> to vector<256x128xf32>
    %c0_5 = arith.constant 0 : index
    %c0_6 = arith.constant 0 : index
    %4 = vector.load %arg3[%c0_5, %c0_6] : memref<128x128xf32, #tpu.memory_space<vmem>>, vector<128x128xf32>
    %cst = arith.constant dense<0.000000e+00> : vector<256x128xf32>
    %5 = tpu.matmul %3, %4, %cst {dimension_numbers = #tpu.dot_dimension_numbers<[1], [0], [0], [1], [0, 0, 1, 1], [], []>} : vector<256x128xf32>, vector<128x128xf32>, vector<256x128xf32> -> vector<256x128xf32>
    %c0_7 = arith.constant 0 : index
    %c0_8 = arith.constant 0 : index
    %6 = vector.load %arg4[%c0_7, %c0_8] : memref<128x128xf32, #tpu.memory_space<vmem>>, vector<128x128xf32>
    %cst_9 = arith.constant dense<0.000000e+00> : vector<64x128xf32>
    %7 = tpu.matmul %1, %6, %cst_9 {dimension_numbers = #tpu.dot_dimension_numbers<[1], [0], [0], [1], [0, 0, 1, 1], [], []>} : vector<64x128xf32>, vector<128x128xf32>, vector<64x128xf32> -> vector<64x128xf32>
    %c0_10 = arith.constant 0 : index
    %c0_11 = arith.constant 0 : index
    %8 = vector.load %arg5[%c0_10, %c0_11] : memref<128x128xf32, #tpu.memory_space<vmem>>, vector<128x128xf32>
    %cst_12 = arith.constant dense<0.000000e+00> : vector<256x128xf32>
    %9 = tpu.matmul %3, %8, %cst_12 {dimension_numbers = #tpu.dot_dimension_numbers<[1], [0], [0], [1], [0, 0, 1, 1], [], []>} : vector<256x128xf32>, vector<128x128xf32>, vector<256x128xf32> -> vector<256x128xf32>
    %c0_13 = arith.constant 0 : index
    %c0_14 = arith.constant 0 : index
    %10 = vector.load %arg6[%c0_13, %c0_14] : memref<1x128xf32, #tpu.memory_space<vmem>>, vector<1x128xf32>
    %11 = vector.broadcast %10 : vector<1x128xf32> to vector<256x128xf32>
    %12 = arith.addf %9, %11 : vector<256x128xf32>
    %cst_15 = arith.constant 0.000000e+00 : f32
    %13 = vector.broadcast %cst_15 : f32 to vector<256x128xf32>
    %14 = arith.maximumf %12, %13 : vector<256x128xf32>
    %c0_16 = arith.constant 0 : index
    %c0_17 = arith.constant 0 : index
    %15 = vector.load %arg5[%c0_16, %c0_17] : memref<128x128xf32, #tpu.memory_space<vmem>>, vector<128x128xf32>
    %cst_18 = arith.constant dense<0.000000e+00> : vector<64x128xf32>
    %16 = tpu.matmul %1, %15, %cst_18 {dimension_numbers = #tpu.dot_dimension_numbers<[1], [0], [0], [1], [0, 0, 1, 1], [], []>} : vector<64x128xf32>, vector<128x128xf32>, vector<64x128xf32> -> vector<64x128xf32>
    %c0_19 = arith.constant 0 : index
    %c0_20 = arith.constant 0 : index
    %17 = vector.load %arg6[%c0_19, %c0_20] : memref<1x128xf32, #tpu.memory_space<vmem>>, vector<1x128xf32>
    %18 = vector.broadcast %17 : vector<1x128xf32> to vector<64x128xf32>
    %19 = arith.addf %16, %18 : vector<64x128xf32>
    %cst_21 = arith.constant 0.000000e+00 : f32
    %20 = vector.broadcast %cst_21 : f32 to vector<64x128xf32>
    %21 = arith.maximumf %19, %20 : vector<64x128xf32>
    %cst_22 = arith.constant dense<0.000000e+00> : vector<256x64xf32>
    %22 = tpu.matmul %5, %7, %cst_22 {dimension_numbers = #tpu.dot_dimension_numbers<[1], [1], [0], [0], [0, 0, 1, 0], [], []>} : vector<256x128xf32>, vector<64x128xf32>, vector<256x64xf32> -> vector<256x64xf32>
    %cst_23 = arith.constant dense<0xFF800000> : vector<256xf32>
    %23 = vector.multi_reduction <maximumf>, %22, %cst_23 [1] : vector<256x64xf32> to vector<256xf32>
    %24 = vector.shape_cast %23 : vector<256xf32> to vector<256x1xf32>
    %25 = vector.broadcast %24 : vector<256x1xf32> to vector<256x64xf32>
    %26 = arith.subf %22, %25 : vector<256x64xf32>
    %27 = math.exp %26 : vector<256x64xf32>
    %cst_24 = arith.constant dense<0.000000e+00> : vector<256xf32>
    %28 = vector.multi_reduction <add>, %27, %cst_24 [1] : vector<256x64xf32> to vector<256xf32>
    %29 = vector.shape_cast %28 : vector<256xf32> to vector<256x1xf32>
    %30 = vector.broadcast %29 : vector<256x1xf32> to vector<256x64xf32>
    %31 = arith.divf %27, %30 : vector<256x64xf32>
    %cst_25 = arith.constant dense<0.000000e+00> : vector<256x128xf32>
    %32 = tpu.matmul %31, %21, %cst_25 {dimension_numbers = #tpu.dot_dimension_numbers<[1], [0], [0], [1], [0, 0, 1, 1], [], []>} : vector<256x64xf32>, vector<64x128xf32>, vector<256x128xf32> -> vector<256x128xf32>
    %c0_26 = arith.constant 0 : index
    %c0_27 = arith.constant 0 : index
    %33 = vector.load %arg7[%c0_26, %c0_27] : memref<128x128xf32, #tpu.memory_space<vmem>>, vector<128x128xf32>
    %cst_28 = arith.constant dense<0.000000e+00> : vector<256x128xf32>
    %34 = tpu.matmul %32, %33, %cst_28 {dimension_numbers = #tpu.dot_dimension_numbers<[1], [0], [0], [1], [0, 0, 1, 1], [], []>} : vector<256x128xf32>, vector<128x128xf32>, vector<256x128xf32> -> vector<256x128xf32>
    %c0_29 = arith.constant 0 : index
    %c0_30 = arith.constant 0 : index
    %35 = vector.load %arg8[%c0_29, %c0_30] : memref<128x128xf32, #tpu.memory_space<vmem>>, vector<128x128xf32>
    %cst_31 = arith.constant dense<0.000000e+00> : vector<256x128xf32>
    %36 = tpu.matmul %14, %35, %cst_31 {dimension_numbers = #tpu.dot_dimension_numbers<[1], [0], [0], [1], [0, 0, 1, 1], [], []>} : vector<256x128xf32>, vector<128x128xf32>, vector<256x128xf32> -> vector<256x128xf32>
    %37 = arith.addf %34, %36 : vector<256x128xf32>
    %c0_32 = arith.constant 0 : index
    %c0_33 = arith.constant 0 : index
    %38 = vector.load %arg9[%c0_32, %c0_33] : memref<1x128xf32, #tpu.memory_space<vmem>>, vector<1x128xf32>
    %39 = vector.broadcast %38 : vector<1x128xf32> to vector<256x128xf32>
    %40 = arith.addf %37, %39 : vector<256x128xf32>
    %cst_34 = arith.constant 0.000000e+00 : f32
    %41 = vector.broadcast %cst_34 : f32 to vector<256x128xf32>
    %42 = arith.maximumf %40, %41 : vector<256x128xf32>
    %c0_35 = arith.constant 0 : index
    %c0_36 = arith.constant 0 : index
    %c0_37 = arith.constant 0 : index
    %43 = vector.load %arg10[%c0_35, %c0_36, %c0_37] : memref<1x256x128xf32, #tpu.memory_space<vmem>>, vector<1x256x128xf32>
    %44 = vector.shape_cast %43 : vector<1x256x128xf32> to vector<256x128xf32>
    %45 = vector.shape_cast %42 : vector<256x128xf32> to vector<1x256x128xf32>
    tpu.vector_store %arg10[%c0_35, %c0_36, %c0_37], %45 {strides = array<i32>} : memref<1x256x128xf32, #tpu.memory_space<vmem>>, vector<1x256x128xf32>,
    return
  }
  func.func @transform_0(%arg0: i32) -> (i32, i32, i32) {
    %c0_i32 = arith.constant 0 : i32
    %c0_i32_0 = arith.constant 0 : i32
    %c0_i32_1 = arith.constant 0 : i32
    return %arg0, %c0_i32, %c0_i32_0 : i32, i32, i32
  }
  func.func @transform_1(%arg0: i32) -> (i32, i32, i32) {
    %c0_i32 = arith.constant 0 : i32
    %c0_i32_0 = arith.constant 0 : i32
    %c0_i32_1 = arith.constant 0 : i32
    return %arg0, %c0_i32, %c0_i32_0 : i32, i32, i32
  }
  func.func @transform_2(%arg0: i32) -> (i32, i32) {
    %c0_i32 = arith.constant 0 : i32
    %c0_i32_0 = arith.constant 0 : i32
    %c0_i32_1 = arith.constant 0 : i32
    return %c0_i32, %c0_i32_0 : i32, i32
  }
  func.func @transform_3(%arg0: i32) -> (i32, i32) {
    %c0_i32 = arith.constant 0 : i32
    %c0_i32_0 = arith.constant 0 : i32
    %c0_i32_1 = arith.constant 0 : i32
    return %c0_i32, %c0_i32_0 : i32, i32
  }
  func.func @transform_4(%arg0: i32) -> (i32, i32) {
    %c0_i32 = arith.constant 0 : i32
    %c0_i32_0 = arith.constant 0 : i32
    %c0_i32_1 = arith.constant 0 : i32
    return %c0_i32, %c0_i32_0 : i32, i32
  }
  func.func @transform_5(%arg0: i32) -> (i32, i32) {
    %c0_i32 = arith.constant 0 : i32
    %c0_i32_0 = arith.constant 0 : i32
    %c0_i32_1 = arith.constant 0 : i32
    return %c0_i32, %c0_i32_0 : i32, i32
  }
  func.func @transform_6(%arg0: i32) -> (i32, i32) {
    %c0_i32 = arith.constant 0 : i32
    %c0_i32_0 = arith.constant 0 : i32
    %c0_i32_1 = arith.constant 0 : i32
    return %c0_i32, %c0_i32_0 : i32, i32
  }
  func.func @transform_7(%arg0: i32) -> (i32, i32) {
    %c0_i32 = arith.constant 0 : i32
    %c0_i32_0 = arith.constant 0 : i32
    %c0_i32_1 = arith.constant 0 : i32
    return %c0_i32, %c0_i32_0 : i32, i32
  }
  func.func @transform_8(%arg0: i32) -> (i32, i32) {
    %c0_i32 = arith.constant 0 : i32
    %c0_i32_0 = arith.constant 0 : i32
    %c0_i32_1 = arith.constant 0 : i32
    return %c0_i32, %c0_i32_0 : i32, i32
  }
  func.func @transform_9(%arg0: i32) -> (i32, i32, i32) {
    %c0_i32 = arith.constant 0 : i32
    %c0_i32_0 = arith.constant 0 : i32
    %c0_i32_1 = arith.constant 0 : i32
    return %arg0, %c0_i32, %c0_i32_0 : i32, i32, i32
  }
}

</mosaic_0001>

<bundles_post_ra>
// kernel: tpu_custom_call.1
= control target key start
LH: loop header
LB: loop body
LE: loop exit
PB: predicated region body
PF: predicated region fallthrough
CT: control target
= control target key end

     0   :  { %s4307_s0 = inlined_call_operand.hbm [shape: f32[2,64,128], index: 0, kind: input, shape index: {}]   ;;  %s4308_s1 = inlined_call_operand.hbm [shape: f32[2,256,128], index: 1, kind: input, shape index: {}]   ;;  %s4309_s2 = inlined_call_operand.hbm [shape: f32[128,128], index: 2, kind: input, shape index: {}]   ;;  %s4310_s3 = inlined_call_operand.hbm [shape: f32[128,128], index: 3, kind: input, shape index: {}]   ;;  %s4311_s4 = inlined_call_operand.hbm [shape: f32[128,128], index: 4, kind: input, shape index: {}]   ;;  %s4312_s5 = inlined_call_operand.vmem [shape: f32[1,128], index: 5, kind: input, shape index: {}]   ;;  %s4313_s6 = inlined_call_operand.hbm [shape: f32[128,128], index: 6, kind: input, shape index: {}]   ;;  %s4314_s7 = inlined_call_operand.hbm [shape: f32[128,128], index: 7, kind: input, shape index: {}]   ;;  %s4315_s8 = inlined_call_operand.vmem [shape: f32[1,128], index: 8, kind: input, shape index: {}]   ;;  %s4316_s9 = inlined_call_operand.hbm [shape: f32[2,256,128], index: 9, kind: output, shape index: {}]  }
   0x1   :  { %4326 = sst [smem:[#allocation33_spill]] %s4309_s2 }
   0x2   :  { %4327 = sst [smem:[#allocation34_spill]] %s4310_s3 }
   0x3   :  { %4328 = sst [smem:[#allocation35_spill]] %s4311_s4 }
   0x4   :  { %4329 = sst [smem:[#allocation36_spill]] %s4313_s6 }
   0x5   :  { %4330 = sst [smem:[#allocation37_spill]] %s4314_s7 }
   0x6   :  { %14 = vsyncpa [#allocation3], 0 }
   0x7   :  { %16 = vsyncpa [#allocation3 + $0x1], 0 }
   0x8   :  { %17 = vsyncpa [#allocation6], 0 }
   0x9   :  { %19 = vsyncpa [#allocation6 + $0x1], 0 }
   0xa   :  { %20 = vsyncpa [#allocation9], 0 }
   0xb   :  { %21 = vsyncpa [#allocation12], 0 }
   0xc   :  { %22 = vsyncpa [#allocation4], 0 }
   0xd   :  { %24 = vsyncpa [#allocation4 + $0x1], 0  ;;  %s3210_s30 = smov 0   ;;  %s3212_s10 = smov 0  }
   0xe   :  { %s3214_s11 = smov 0   ;;  %s3216_s12 = smov 0  }
   0xf LB: > { %4331 = sst [smem:[#allocation21_spill]] %s3145_s11  ;;  %s3234_s16 = sadd.s32 4294967295, %s3149_s12   ;;  %s3149_s12 = sphi %s3216_s12, %s4371_s12   ;;  %s3145_s11 = sphi %s3214_s11, %s4373_s11   ;;  %s3141_s10 = sphi %s3212_s10, %s4375_s10   ;;  %s3137_s30 = sphi %s3210_s30, %s4374_s30  }
  0x10   : > { %s4332_s2 = sld [smem:[#allocation33_spill]]  ;;  %p2526_p0 = scmp.ge.s32.totalorder %s3149_s12, 1 }
  0x11   : > { %p51_p1 = scmp.eq.s32.totalorder %s3234_s16, 0  ;;  %p260_p2 = scmp.lt.s32.totalorder %s3149_s12, 3 }
  0x12   : > { %s3151_s18 = smov [#allocation7]   ;;  %s4334_s3 = sld [smem:[#allocation34_spill]] }
  0x13   : > { %p3239_p3 = pnand %p2526_p0, %p260_p2  ;;  %s273_s19 = sshll.u32 %s3151_s18, 4  ;;  %s274_s19 = int_to_ptr.vmem [resolvable:$true] %s273_s19 }
  0x14   : > { %s4336_s6 = sld [smem:[#allocation36_spill]]  ;;  %s3152_s27 = smov [#allocation8]  }
  0x15   : > { %p2646_p4 = pneg %p3239_p3  ;;  %s287_s28 = sshll.u32 %s3152_s27, 4  ;;  %s288_s28 = int_to_ptr.vmem [resolvable:$true] %s287_s28 }
  0x16   : > { %s271_s15 = sshll.u32 %s4332_s2, 4  ;;  %s4317_s29 = smov 128   ;;  %s272_s15 = int_to_ptr.hbm [resolvable:$true] %s271_s15 }
  0x17   : > { %p3251_p6 = pnand %p2646_p4, %p51_p1  ;;  %s4319_s13 = smov 8  }
  0x18   : > { %s285_s22 = sshll.u32 %s4334_s3, 4  ;;  %s4337_s4 = sld [smem:[#allocation35_spill]]  ;;  %s286_s22 = int_to_ptr.hbm [resolvable:$true] %s285_s22 }
  0x19   : > { %2649 = dma.hbm_to_vmem [thread:$0]  (!%p3251_p6), %s272_s15, 2048, %s274_s19, [#allocation6], %s4317_s29, %s4317_s29, %s4319_s13  }
  0x1a   : > { %s316_s26 = sshll.u32 %s4336_s6, 4  ;;  %s3155_s21 = smov [#allocation11]   ;;  %s317_s26 = int_to_ptr.hbm [resolvable:$true] %s316_s26 }
  0x1b   : > { %2652 = dma.hbm_to_vmem [thread:$0]  (!%p3251_p6), %s286_s22, 2048, %s288_s28, [#allocation9], %s4317_s29, %s4317_s29, %s4319_s13  }
  0x1c   : > { %s318_s24 = sshll.u32 %s3155_s21, 4  ;;  %s3156_s15 = smov [#allocation10]   ;;  %s319_s24 = int_to_ptr.vmem [resolvable:$true] %s318_s24 }
  0x1d   : > { %2658 = dma.hbm_to_vmem [thread:$0]  (!%p3251_p6), %s317_s26, 2048, %s319_s24, [#allocation12], %s4317_s29, %s4317_s29, %s4319_s13  }
  0x1e   : > { %s299_s20 = sshll.u32 %s4337_s4, 4  ;;  %s301_s19 = sshll.u32 %s3156_s15, 4  ;;  %s300_s20 = int_to_ptr.hbm [resolvable:$true] %s299_s20  ;;  %s302_s19 = int_to_ptr.vmem [resolvable:$true] %s301_s19 }
  0x1f   : > { %s4338_s7 = sld [smem:[#allocation37_spill]]  ;;  %s3157_s26 = smov [#allocation13]  }
  0x20   : > { %2655 = dma.hbm_to_vmem [thread:$0]  (!%p3251_p6), %s300_s20, 2048, %s302_s19, [#allocation9], %s4317_s29, %s4317_s29, %s4319_s13  }
  0x21   : > { %s332_s28 = sshll.u32 %s3157_s26, 4  ;;  %s2525_s14 = sadd.s32 4294967294, %s3149_s12   ;;  %s333_s28 = int_to_ptr.vmem [resolvable:$true] %s332_s28 }
  0x22   : > { %s3291_s18 = sadd.s32 1, %s3149_s12   ;;  %s37_s21 = sadd.s32 1, %s3145_s11 }
  0x23   : > { %4339 = sst [smem:[#allocation22_spill]] %s3291_s18  ;;  %s34_s24 = ssub.s32 %s3149_s12, %s3291_s18 }
  0x24   : > { %p44_p7 = scmp.ne.s32.totalorder %s3145_s11, %s3141_s10  ;;  %p35_p8 = scmp.eq.s32.totalorder %s34_s24, 0 }
  0x25   : > { %s330_s27 = sshll.u32 %s4338_s7, 4  ;;  %p45_p9 = scmp.eq.s32.totalorder %s3149_s12, 0  ;;  %s331_s27 = int_to_ptr.hbm [resolvable:$true] %s330_s27 }
  0x26   : > { %2661 = dma.hbm_to_vmem [thread:$0]  (!%p3251_p6), %s331_s27, 2048, %s333_s28, [#allocation12], %s4317_s29, %s4317_s29, %s4319_s13  }
  0x27   : > { %p50_p10 = scmp.ne.s32.totalorder %s3141_s10, %s3137_s30  ;;  %p247_p11 = scmp.eq.s32.totalorder %s3234_s16, 1 }
  0x28   : > { %s3303_s20 = scalar_select %p35_p8, %s3145_s11, %s37_s21  }
  0x29   : > { %p3305_p12 = por %p45_p9, %p44_p7  ;;  %p3311_p13 = por %p51_p1, %p50_p10 }
  0x2a   : > { %4340 = sst [smem:[#allocation23_spill]] %s3303_s20  ;;  %p3315_p0 = por %p247_p11, %p44_p7 }
  0x2b   : > { %p253_p2 = scmp.eq.s32.totalorder %s2525_s14, 1  ;;  %p2678_p4 = scmp.lt.s32.totalorder %s3149_s12, 2 }
  0x2c   : > { %s3321_s22 = sand.u32 1, %s3145_s11   ;;  %s2585_s26 = sshll.u32 %s3149_s12, 6 }
  0x2d   : > { %p3323_p6 = por %p253_p2, %p50_p10  ;;  %s2533_s27 = sshll.u32 %s3321_s22, 6 }
  0x2e   : > { %s358_s24 = scalar_lea.hbm %s4307_s0, %s2585_s26  ;;  %s353_s13 = scalar_lea.vmem [#allocation2], %s2533_s27 }
  0x2f   : > { %s359_s29 = sshll.u32 %s358_s24, 4  ;;  %s361_s2 = sshll.u32 %s353_s13, 4  ;;  %s360_s29 = int_to_ptr.hbm [resolvable:$true] %s359_s29  ;;  %s362_s2 = int_to_ptr.vmem [resolvable:$true] %s361_s2 }
  0x30   : > { %p3334_p7 = pnand %p2678_p4, %p3305_p12  ;;  %s371_s3 = sand.u32 1, %s3149_s12  }
  0x31   : > { %s2536_s4 = sshll.u32 %s3321_s22, 8  ;;  %s350_s6 = scalar_lea.sflag [#allocation3], %s3321_s22 }
  0x32   : > { %s3007_s7 = sshra.s32 %s360_s29, 4  ;;  %p3011_p9 = pneg %p3334_p7  ;;  %s3008_s7 = int_to_ptr.hbm [resolvable:$true] %s3007_s7 }
  0x33   : > { %s3009_s20 = scalar_lea.hbm %s3008_s7, 64  ;;  %s3014_s27 = scalar_lea.hbm %s4307_s0, 128 }
  0x34   : > { %p3010_p8 = scmp.ne.s32.totalorder %s3008_s7, %s3009_s20  ;;  %p3015_p12 = scmp.lt.s32.totalorder %s3008_s7, %s4307_s0 }
  0x35   : > { %p3016_p2 = scmp.lt.s32.totalorder %s3014_s27, %s3009_s20 }
  0x36   : > { %p3012_p10 = pnand %p3011_p9, %p3010_p8 }
  0x37   : > { %p3017_p4 = por %p3016_p2, %p3015_p12 }
  0x38   : > { %p3013_p11 = pneg %p3012_p10 }
  0x3a   : > { %p3018_p5 = pnand %p3017_p4, %p3013_p11 }
  0x3c   : > { %3021 = shalt.err (!%p3018_p5)
}
  0x3d   : > { %s4346_s22 = smov 8   ;;  %s4347_s21 = smov 128  }
  0x3e   : > { %2665 = dma.hbm_to_vmem [thread:$0]  (!%p3334_p7), %s360_s29, 1024, %s362_s2, %s350_s6, %s4347_s21, %s4347_s21, %s4346_s22  }
  0x3f   : > { %s2586_s24 = sshll.u32 %s3149_s12, 8  ;;  %s375_s11 = scalar_lea.vmem [#allocation5], %s2536_s4 }
  0x40   : > { %s383_s13 = sshll.u32 %s375_s11, 4  ;;  %s380_s26 = scalar_lea.hbm %s4308_s1, %s2586_s24  ;;  %s384_s13 = int_to_ptr.vmem [resolvable:$true] %s383_s13 }
  0x41   : > { %s381_s7 = sshll.u32 %s380_s26, 4  ;;  %s372_s20 = scalar_lea.sflag [#allocation6], %s371_s3  ;;  %s382_s7 = int_to_ptr.hbm [resolvable:$true] %s381_s7 }
  0x42   : > { %s3037_s27 = sshra.s32 %s382_s7, 4  ;;  %s3044_s4 = scalar_lea.hbm %s4308_s1, 512  ;;  %s3038_s27 = int_to_ptr.hbm [resolvable:$true] %s3037_s27 }
  0x43   : > { %s3039_s28 = scalar_lea.hbm %s3038_s27, 256  ;;  %p3045_p11 = scmp.lt.s32.totalorder %s3038_s27, %s4308_s1 }
  0x44   : > { %p3040_p5 = scmp.ne.s32.totalorder %s3038_s27, %s3039_s28  ;;  %p3046_p12 = scmp.lt.s32.totalorder %s3044_s4, %s3039_s28 }
  0x46   : > { %p3042_p8 = pnand %p3040_p5, %p3011_p9  ;;  %p3047_p2 = por %p3046_p12, %p3045_p11 }
  0x48   : > { %p3043_p10 = pneg %p3042_p8 }
  0x4a   : > { %p3048_p4 = pnand %p3047_p2, %p3043_p10 }
  0x4c   : > { %3051 = shalt.err (!%p3048_p4)
}
  0x4d   : > { %2668 = dma.hbm_to_vmem [thread:$0]  (!%p3334_p7), %s382_s7, 4096, %s384_s13, %s372_s20, %s4347_s21, %s4347_s21, %s4346_s22  }
  0x4e   : > { %395 = sbr.rel (%p3239_p3) target bundleno = 1565 (0x61d), region = 56 }
  0x53   : > { %s3378_s3 = sand.u32 1, %s3141_s10  }
  0x54   : > { %s2540_s18 = sshll.u32 %s3378_s3, 6  ;;  %s398_s24 = scalar_lea.sflag [#allocation3], %s3378_s3 }
  0x55   : > { %s3382_s23 = scalar_lea.vmem [#allocation2], %s2540_s18 }
  0x56   : > { %3112 = dma.done.wait (%p3311_p13), %s398_s24, 1024  }
  0x57   : > { %3114 = vsyncadd (%p3311_p13), %s398_s24, 4294966272  ;;  %s407_s17 = sand.u32 1, %s3234_s16   ;;  %s2541_s14 = sshll.u32 %s3378_s3, 8 }
  0x58   : > { %s408_s22 = scalar_lea.sflag [#allocation6], %s407_s17  ;;  %s3392_s21 = scalar_lea.vmem [#allocation5], %s2541_s14 }
  0x59   : > { %3116 = dma.done.wait (%p3311_p13), %s408_s22, 4096  }
  0x5a   : > { %3118 = vsyncadd (%p3311_p13), %s408_s22, 4294963200 }
  0x5b   : > { %3120 = dma.done.wait (%p51_p1), [#allocation6], 2048  }
  0x5c   : > { %3122 = vsyncadd (%p51_p1), [#allocation6], 4294965248 }
  0x5d   : > { %3124 = dma.done.wait (%p51_p1), [#allocation9], 4096  }
  0x5e   : > { %3126 = vsyncadd (%p51_p1), [#allocation9], 4294963200 }
  0x5f   : > { %3128 = dma.done.wait (%p51_p1), [#allocation12], 4096  }
  0x60   : > { %3130 = vsyncadd (%p51_p1), [#allocation12], 4294963200  ;;  %v532_v0 = vld [vmem:[#allocation7 + $0x78] sm:$0xff]  ;;  %v531_v1 = vld [vmem:[#allocation7 + $0x70] sm:$0xff]  ;;  %vm1030_vm0 = vcmask 523264   ;;  %s4094_s20 = scalar_lea.vmem [#allocation14], %s2541_s14 }
  0x61   : > { %2588 = vmatpush.msra.mxu1 %v532_v0  ;;  %533 = vmatpush.msra.mxu0 %v532_v0  ;;  %v530_v2 = vld [vmem:[#allocation7 + $0x68] sm:$0xff]  ;;  %v529_v3 = vld [vmem:[#allocation7 + $0x60] sm:$0xff]  ;;  %v528_v4 = vld [vmem:[#allocation7 + $0x58] sm:$0xff]  ;;  %s2587_s2 = sshll.u32 %s3234_s16, 8  ;;  %s2379_s29 = sshll.u32 %s4094_s20, 4  ;;  %s2380_s29 = int_to_ptr.vmem [resolvable:$true] %s2379_s29 }
  0x62   : > { %v527_v5 = vld [vmem:[#allocation7 + $0x50] sm:$0xff]  ;;  %v526_v6 = vld [vmem:[#allocation7 + $0x48] sm:$0xff]  ;;  %v525_v7 = vld [vmem:[#allocation7 + $0x40] sm:$0xff]  ;;  %s2378_s11 = scalar_lea.hbm %s4316_s9, %s2587_s2  ;;  %s2367_s24 = scalar_lea.sflag [#allocation4], %s3378_s3 }
  0x63   : > { %2589 = vmatpush.msra.mxu1 %v531_v1  ;;  %534 = vmatpush.msra.mxu0 %v531_v1  ;;  %v524_v8 = vld [vmem:[#allocation7 + $0x38] sm:$0xff]  ;;  %v523_v9 = vld [vmem:[#allocation7 + $0x30] sm:$0xff]  ;;  %v522_v10 = vld [vmem:[#allocation7 + $0x28] sm:$0xff]  ;;  %s2381_s18 = sshll.u32 %s2378_s11, 4  ;;  %s3087_s22 = scalar_lea.hbm %s4316_s9, 512  ;;  %s2382_s18 = int_to_ptr.hbm [resolvable:$true] %s2381_s18 }
  0x64   : > { %v521_v11 = vld [vmem:[#allocation7 + $0x20] sm:$0xff]  ;;  %v520_v12 = vld [vmem:[#allocation7 + $0x18] sm:$0xff]  ;;  %v519_v13 = vld [vmem:[#allocation7 + $0x10] sm:$0xff] }
  0x65   : > { %2590 = vmatpush.msra.mxu1 %v530_v2  ;;  %535 = vmatpush.msra.mxu0 %v530_v2  ;;  %v518_v14 = vld [vmem:[#allocation7 + $0x8] sm:$0xff]  ;;  %v517_v15 = vld [vmem:[#allocation7] sm:$0xff]  ;;  %v661_v17 = vld [vmem:[#allocation8 + $0x78] sm:$0xff] }
  0x66   : > { %v3411_v16 = vld [vmem:[%s3392_s21 + $0xa0] sm:$0xff]  ;;  %v660_v18 = vld [vmem:[#allocation8 + $0x70] sm:$0xff]  ;;  %v3415_v19 = vld [vmem:[%s3392_s21 + $0xa8] sm:$0xff] }
  0x67   : > { %2591 = vmatpush.msra.mxu1 %v529_v3  ;;  %536 = vmatpush.msra.mxu0 %v529_v3  ;;  %v659_v20 = vld [vmem:[#allocation8 + $0x68] sm:$0xff]  ;;  %v3419_v21 = vld [vmem:[%s3392_s21 + $0xb0] sm:$0xff]  ;;  %v658_v22 = vld [vmem:[#allocation8 + $0x60] sm:$0xff] }
  0x68   : > { %v3423_v23 = vld [vmem:[%s3392_s21 + $0xb8] sm:$0xff]  ;;  %v656_v25 = vld [vmem:[#allocation8 + $0x50] sm:$0xff]  ;;  %v3427_v26 = vld [vmem:[%s3392_s21 + $0xc0] sm:$0xff] }
  0x69   : > { %2592 = vmatpush.msra.mxu1 %v528_v4  ;;  %537 = vmatpush.msra.mxu0 %v528_v4  ;;  %v657_v24 = vld [vmem:[#allocation8 + $0x58] sm:$0xff]  ;;  %v655_v27 = vld [vmem:[#allocation8 + $0x48] sm:$0xff]  ;;  %v654_v29 = vld [vmem:[#allocation8 + $0x40] sm:$0xff] }
  0x6a   : > { %v3431_v28 = vld [vmem:[%s3392_s21 + $0xc8] sm:$0xff]  ;;  %v3435_v30 = vld [vmem:[%s3392_s21 + $0xd0] sm:$0xff]  ;;  %v653_v31 = vld [vmem:[#allocation8 + $0x38] sm:$0xff] }
  0x6b   : > { %2593 = vmatpush.msra.mxu1 %v527_v5  ;;  %538 = vmatpush.msra.mxu0 %v527_v5  ;;  %v652_v32 = vld [vmem:[#allocation8 + $0x30] sm:$0xff]  ;;  %v651_v33 = vld [vmem:[#allocation8 + $0x28] sm:$0xff]  ;;  %v650_v34 = vld [vmem:[#allocation8 + $0x20] sm:$0xff] }
  0x6c   : > { %v3439_v35 = vld [vmem:[%s3392_s21 + $0xd8] sm:$0xff]  ;;  %v648_v37 = vld [vmem:[#allocation8 + $0x10] sm:$0xff]  ;;  %v647_v38 = vld [vmem:[#allocation8 + $0x8] sm:$0xff] }
  0x6d   : > { %2594 = vmatpush.msra.mxu1 %v526_v6  ;;  %539 = vmatpush.msra.mxu0 %v526_v6  ;;  %v649_v36 = vld [vmem:[#allocation8 + $0x18] sm:$0xff]  ;;  %v646_v39 = vld [vmem:[#allocation8] sm:$0xff]  ;;  %v3447_v41 = vld [vmem:[%s3392_s21 + $0xe8] sm:$0xff] }
  0x6e   : > { %v3443_v40 = vld [vmem:[%s3392_s21 + $0xe0] sm:$0xff]  ;;  %v3451_v42 = vld [vmem:[%s3392_s21 + $0xf0] sm:$0xff]  ;;  %v3455_v43 = vld [vmem:[%s3392_s21 + $0xf8] sm:$0xff] }
  0x6f   : > { %2595 = vmatpush.msra.mxu1 %v525_v7  ;;  %540 = vmatpush.msra.mxu0 %v525_v7  ;;  %v3459_v44 = vld [vmem:[%s3382_s23] sm:$0xff]  ;;  %v3463_v45 = vld [vmem:[%s3382_s23 + $0x8] sm:$0xff]  ;;  %v3467_v46 = vld [vmem:[%s3382_s23 + $0x10] sm:$0xff] }
  0x70   : > { %v3471_v47 = vld [vmem:[%s3382_s23 + $0x18] sm:$0xff]  ;;  %v3477_v49 = vld [vmem:[%s3382_s23 + $0x20] sm:$0xff]  ;;  %v3483_v51 = vld [vmem:[%s3382_s23 + $0x28] sm:$0xff] }
  0x71   : > { %2596 = vmatpush.msra.mxu1 %v524_v8  ;;  %541 = vmatpush.msra.mxu0 %v524_v8  ;;  %v3489_v53 = vld [vmem:[%s3382_s23 + $0x30] sm:$0xff]  ;;  %v3495_v55 = vld [vmem:[%s3382_s23 + $0x38] sm:$0xff]  ;;  %v3498_v56 = vld [vmem:[%s3392_s21] sm:$0xff]  ;;  %s3081_s23 = sshra.s32 %s2382_s18, 4  ;;  %s3082_s23 = int_to_ptr.hbm [resolvable:$true] %s3081_s23 }
  0x72   : > { %4348 = vst [vmem:[#allocation24_spill] sm:$0xff] %v3495_v55  ;;  %v3505_v58 = vld [vmem:[%s3392_s21 + $0x8] sm:$0xff]  ;;  %v3511_v60 = vld [vmem:[%s3392_s21 + $0x10] sm:$0xff]  ;;  %v3517_v62 = vld [vmem:[%s3392_s21 + $0x18] sm:$0xff]  ;;  %s3083_s16 = scalar_lea.hbm %s3082_s23, 256  ;;  %p3088_p7 = scmp.lt.s32.totalorder %s3082_s23, %s4316_s9 }
  0x73   : > { %2597 = vmatpush.msra.mxu1 %v523_v9  ;;  %542 = vmatpush.msra.mxu0 %v523_v9  ;;  %v3523_v0 = vld [vmem:[%s3392_s21 + $0x20] sm:$0xff]  ;;  %v3529_v2 = vld [vmem:[%s3392_s21 + $0x28] sm:$0xff]  ;;  %v3535_v4 = vld [vmem:[%s3392_s21 + $0x30] sm:$0xff]  ;;  %p3084_p1 = scmp.ne.s32.totalorder %s3082_s23, %s3083_s16  ;;  %p3089_p9 = scmp.lt.s32.totalorder %s3087_s22, %s3083_s16 }
  0x74   : > { %v3541_v6 = vld [vmem:[%s3392_s21 + $0x38] sm:$0xff]  ;;  %v3547_v8 = vld [vmem:[%s3392_s21 + $0x40] sm:$0xff] }
  0x75   : > { %2598 = vmatpush.msra.mxu1 %v522_v10  ;;  %543 = vmatpush.msra.mxu0 %v522_v10  ;;  %v3551_v10 = vld [vmem:[%s3392_s21 + $0x48] sm:$0xff]  ;;  %p3085_p3 = pnand %p3084_p1, %p3315_p0  ;;  %p3090_p5 = por %p3089_p9, %p3088_p7 }
  0x77   : > { %2599 = vmatpush.msra.mxu1 %v521_v11  ;;  %544 = vmatpush.msra.mxu0 %v521_v11  ;;  %p3086_p13 = pneg %p3085_p3 }
  0x79   : > { %2600 = vmatpush.msra.mxu1 %v520_v12  ;;  %545 = vmatpush.msra.mxu0 %v520_v12  ;;  %v3555_v12 = vld [vmem:[%s3392_s21 + $0x50] sm:$0xff]  ;;  %p3091_p8 = pnand %p3090_p5, %p3086_p13 }
  0x7b   : > { %2601 = vmatpush.msra.mxu1 %v519_v13  ;;  %546 = vmatpush.msra.mxu0 %v519_v13 }
  0x7d   : > { %2602 = vmatpush.msra.mxu1 %v518_v14  ;;  %547 = vmatpush.msra.mxu0 %v518_v14  ;;  %v3559_v14 = vld [vmem:[%s3392_s21 + $0x58] sm:$0xff] }
  0x7f   : > { %2603 = vmatpush.msra.mxu1 %v517_v15  ;;  %548 = vmatpush.msra.mxu0 %v517_v15 }
  0x80   : > { %609 = vmatmul.f32.vlgmr.msra.gmra.mxu1 %v3411_v16  ;;  %549 = vmatmul.f32.vlgmr.msra.gmra.mxu0 %v3498_v56 }
  0x81   : > { %662 = vmatpush.msrb.mxu1 %v661_v17  ;;  %v3563_v17 = vld [vmem:[%s3392_s21 + $0x60] sm:$0xff] }
  0x83   : > { %663 = vmatpush.msrb.mxu1 %v660_v18 }
  0x85   : > { %664 = vmatpush.msrb.mxu1 %v659_v20  ;;  %v3567_v20 = vld [vmem:[%s3392_s21 + $0x68] sm:$0xff] }
  0x87   : > { %665 = vmatpush.msrb.mxu1 %v658_v22 }
  0x88   : > { %612 = vmatmul.f32.gmra.mxu1 %v3415_v19  ;;  %552 = vmatmul.f32.gmra.mxu0 %v3505_v58 }
  0x89   : > { %666 = vmatpush.msrb.mxu1 %v657_v24  ;;  %v3571_v24 = vld [vmem:[%s3392_s21 + $0x70] sm:$0xff] }
  0x8b   : > { %667 = vmatpush.msrb.mxu1 %v656_v25 }
  0x8d   : > { %668 = vmatpush.msrb.mxu1 %v655_v27  ;;  %v3575_v27 = vld [vmem:[%s3392_s21 + $0x78] sm:$0xff] }
  0x8f   : > { %669 = vmatpush.msrb.mxu1 %v654_v29 }
  0x90   : > { %615 = vmatmul.f32.gmra.mxu1 %v3419_v21  ;;  %555 = vmatmul.f32.gmra.mxu0 %v3511_v60 }
  0x91   : > { %670 = vmatpush.msrb.mxu1 %v653_v31 }
  0x93   : > { %671 = vmatpush.msrb.mxu1 %v652_v32  ;;  %v3579_v32 = vld [vmem:[%s3392_s21 + $0x80] sm:$0xff] }
  0x95   : > { %672 = vmatpush.msrb.mxu1 %v651_v33 }
  0x97   : > { %673 = vmatpush.msrb.mxu1 %v650_v34  ;;  %v3583_v34 = vld [vmem:[%s3392_s21 + $0x88] sm:$0xff] }
  0x98   : > { %618 = vmatmul.f32.gmra.mxu1 %v3423_v23  ;;  %558 = vmatmul.f32.gmra.mxu0 %v3517_v62 }
  0x99   : > { %674 = vmatpush.msrb.mxu1 %v649_v36 }
  0x9b   : > { %675 = vmatpush.msrb.mxu1 %v648_v37  ;;  %v3587_v37 = vld [vmem:[%s3392_s21 + $0x90] sm:$0xff] }
  0x9d   : > { %676 = vmatpush.msrb.mxu1 %v647_v38 }
  0x9f   : > { %677 = vmatpush.msrb.mxu1 %v646_v39  ;;  %v3591_v39 = vld [vmem:[%s3392_s21 + $0x98] sm:$0xff] }
  0xa0   : > { %621 = vmatmul.f32.gmra.mxu1 %v3427_v26  ;;  %561 = vmatmul.f32.gmra.mxu0 %v3523_v0  ;;  %4356 = vst [vmem:[#allocation32_spill] sm:$0xff] %v3591_v39 }
  0xa8   : > { %624 = vmatmul.f32.gmra.mxu1 %v3431_v28  ;;  %564 = vmatmul.f32.gmra.mxu0 %v3529_v2 }
  0xb0   : > { %627 = vmatmul.f32.gmra.mxu1 %v3435_v30  ;;  %567 = vmatmul.f32.gmra.mxu0 %v3535_v4 }
  0xb8   : > { %630 = vmatmul.f32.gmra.mxu1 %v3439_v35  ;;  %570 = vmatmul.f32.gmra.mxu0 %v3541_v6 }
  0xc0   : > { %633 = vmatmul.f32.gmra.mxu1 %v3443_v40  ;;  %573 = vmatmul.f32.gmra.mxu0 %v3547_v8 }
  0xc8   : > { %636 = vmatmul.f32.gmra.mxu1 %v3447_v41  ;;  %576 = vmatmul.f32.gmra.mxu0 %v3551_v10 }
  0xd0   : > { %639 = vmatmul.f32.gmra.mxu1 %v3451_v42  ;;  %579 = vmatmul.f32.gmra.mxu0 %v3555_v12 }
  0xd8   : > { %642 = vmatmul.f32.gmra.mxu1 %v3455_v43  ;;  %582 = vmatmul.f32.gmra.mxu0 %v3559_v14 }
  0xe0   : > { %678 = vmatmul.f32.vlgmr.msrb.gmra.mxu1 %v3459_v44  ;;  %585 = vmatmul.f32.gmra.mxu0 %v3563_v17 }
  0xe8   : > { %681 = vmatmul.f32.gmra.mxu1 %v3463_v45  ;;  %588 = vmatmul.f32.gmra.mxu0 %v3567_v20 }
  0xf0   : > { %684 = vmatmul.f32.gmra.mxu1 %v3467_v46  ;;  %591 = vmatmul.f32.gmra.mxu0 %v3571_v24 }
  0xf8   : > { %687 = vmatmul.f32.gmra.mxu1 %v3471_v47  ;;  %594 = vmatmul.f32.gmra.mxu0 %v3575_v27 }
  0xfd   : > { %v3474_v48 = vpop.f32.mrf.mxu1  ;;  %v550_v29 = vpop.f32.mrf.mxu0 }
 0x100   : > { %690 = vmatmul.f32.gmra.mxu1 %v3477_v49  ;;  %597 = vmatmul.f32.gmra.mxu0 %v3579_v32 }
 0x105   : > { %v3480_v50 = vpop.f32.mrf.mxu1  ;;  %v553_v33 = vpop.f32.mrf.mxu0 }
 0x108   : > { %693 = vmatmul.f32.gmra.mxu1 %v3483_v51  ;;  %600 = vmatmul.f32.gmra.mxu0 %v3583_v34 }
 0x10d   : > { %v3486_v52 = vpop.f32.mrf.mxu1  ;;  %v556_v36 = vpop.f32.mrf.mxu0 }
 0x110   : > { %696 = vmatmul.f32.gmra.mxu1 %v3489_v53  ;;  %603 = vmatmul.f32.gmra.mxu0 %v3587_v37 }
 0x115   : > { %v3492_v54 = vpop.f32.mrf.mxu1  ;;  %v559_v38 = vpop.f32.mrf.mxu0 }
 0x118   : > { %699 = vmatmul.f32.gmra.mxu1 %v3495_v55  ;;  %606 = vmatmul.f32.gmra.mxu0 %v3591_v39  ;;  %v704_v39 = vld [vmem:[#allocation10 + $0x8] sm:$0xff] }
 0x11d   : > { %v3502_v57 = vpop.f32.mrf.mxu1 }
 0x125   : > { %v3508_v59 = vpop.f32.mrf.mxu1 }
 0x126   : > { %4349 = vst [vmem:[#allocation25_spill] sm:$0xff] %v3508_v59  ;;  %v703_v59 = vld [vmem:[#allocation10] sm:$0xff] }
 0x12d   : > { %v3514_v61 = vpop.f32.mrf.mxu1 }
 0x12e   : > { %4350 = vst [vmem:[#allocation26_spill] sm:$0xff] %v3514_v61  ;;  %v705_v61 = vld [vmem:[#allocation10 + $0x10] sm:$0xff] }
 0x135   : > { %v3520_v63 = vpop.f32.mrf.mxu1 }
 0x136   : > { %4351 = vst [vmem:[#allocation27_spill] sm:$0xff] %v3520_v63  ;;  %v707_v63 = vld [vmem:[#allocation10 + $0x20] sm:$0xff] }
 0x13d   : > { %v3526_v1 = vpop.f32.mrf.mxu1 }
 0x13e   : > { %4352 = vst [vmem:[#allocation28_spill] sm:$0xff] %v3526_v1  ;;  %v708_v1 = vld [vmem:[#allocation10 + $0x28] sm:$0xff] }
 0x145   : > { %v3532_v3 = vpop.f32.mrf.mxu1 }
 0x146   : > { %4353 = vst [vmem:[#allocation29_spill] sm:$0xff] %v3532_v3  ;;  %v709_v3 = vld [vmem:[#allocation10 + $0x30] sm:$0xff] }
 0x14d   : > { %v3538_v5 = vpop.f32.mrf.mxu1 }
 0x14e   : > { %4354 = vst [vmem:[#allocation30_spill] sm:$0xff] %v3538_v5 }
 0x155   : > { %v3544_v7 = vpop.f32.mrf.mxu1 }
 0x156   : > { %4355 = vst [vmem:[#allocation31_spill] sm:$0xff] %v3544_v7  ;;  %v716_v7 = vld [vmem:[#allocation10 + $0x68] sm:$0xff] }
 0x15d   : > { %v679_v9 = vpop.f32.mrf.mxu1 }
 0x165   : > { %v682_v11 = vpop.f32.mrf.mxu1 }
 0x16d   : > { %v685_v13 = vpop.f32.mrf.mxu1 }
 0x175   : > { %v688_v15 = vpop.f32.mrf.mxu1 }
 0x17d   : > { %v691_v18 = vpop.f32.mrf.mxu1 }
 0x185   : > { %v694_v22 = vpop.f32.mrf.mxu1 }
 0x18d   : > { %v697_v25 = vpop.f32.mrf.mxu1 }
 0x195   : > { %v700_v31 = vpop.f32.mrf.mxu1 }
 0x196   : > { %925 = vmatpush.xpose.msra.mxu1 %v700_v31 }
 0x19a   : > { %926 = vmatpush.xpose.msra.mxu1 %v697_v25  ;;  %v562_v25 = vpop.f32.mrf.mxu0 }
 0x19e   : > { %927 = vmatpush.xpose.msra.mxu1 %v694_v22 }
 0x1a2   : > { %928 = vmatpush.xpose.msra.mxu1 %v691_v18  ;;  %v565_v22 = vpop.f32.mrf.mxu0  ;;  %v718_v18 = vld [vmem:[#allocation10 + $0x78] sm:$0xff] }
 0x1a3   : > { %2604 = vmatpush.msra.mxu3 %v718_v18  ;;  %723 = vmatpush.msra.mxu2 %v718_v18 }
 0x1a6   : > { %929 = vmatpush.xpose.msra.mxu1 %v688_v15  ;;  %v717_v15 = vld [vmem:[#allocation10 + $0x70] sm:$0xff] }
 0x1a7   : > { %2605 = vmatpush.msra.mxu3 %v717_v15  ;;  %724 = vmatpush.msra.mxu2 %v717_v15 }
 0x1a9   : > { %2606 = vmatpush.msra.mxu3 %v716_v7  ;;  %725 = vmatpush.msra.mxu2 %v716_v7 }
 0x1aa   : > { %930 = vmatpush.xpose.msra.mxu1 %v685_v13  ;;  %v568_v31 = vpop.f32.mrf.mxu0  ;;  %v715_v13 = vld [vmem:[#allocation10 + $0x60] sm:$0xff] }
 0x1ab   : > { %2607 = vmatpush.msra.mxu3 %v715_v13  ;;  %726 = vmatpush.msra.mxu2 %v715_v13 }
 0x1ae   : > { %931 = vmatpush.xpose.msra.mxu1 %v682_v11  ;;  %v714_v11 = vld [vmem:[#allocation10 + $0x58] sm:$0xff] }
 0x1af   : > { %2608 = vmatpush.msra.mxu3 %v714_v11  ;;  %727 = vmatpush.msra.mxu2 %v714_v11 }
 0x1b2   : > { %932 = vmatpush.xpose.msra.mxu1 %v679_v9  ;;  %v571_v5 = vpop.f32.mrf.mxu0  ;;  %v713_v9 = vld [vmem:[#allocation10 + $0x50] sm:$0xff] }
 0x1b3   : > { %2609 = vmatpush.msra.mxu3 %v713_v9  ;;  %728 = vmatpush.msra.mxu2 %v713_v9 }
 0x1b5   : > { %933 = vmatmul.f32.vlgmr.msra.gmra.mxu1 %v550_v29  ;;  %v712_v29 = vld [vmem:[#allocation10 + $0x48] sm:$0xff] }
 0x1b6   : > { %2610 = vmatpush.msra.mxu3 %v712_v29  ;;  %729 = vmatpush.msra.mxu2 %v712_v29 }
 0x1bd   : > { %936 = vmatmul.f32.gmra.mxu1 %v553_v33  ;;  %v711_v33 = vld [vmem:[#allocation10 + $0x40] sm:$0xff] }
 0x1be   : > { %2611 = vmatpush.msra.mxu3 %v711_v33  ;;  %730 = vmatpush.msra.mxu2 %v711_v33 }
 0x1c5   : > { %939 = vmatmul.f32.gmra.mxu1 %v556_v36  ;;  %v710_v36 = vld [vmem:[#allocation10 + $0x38] sm:$0xff] }
 0x1c6   : > { %2612 = vmatpush.msra.mxu3 %v710_v36  ;;  %731 = vmatpush.msra.mxu2 %v710_v36 }
 0x1c8   : > { %2613 = vmatpush.msra.mxu3 %v709_v3  ;;  %732 = vmatpush.msra.mxu2 %v709_v3 }
 0x1ca   : > { %2614 = vmatpush.msra.mxu3 %v708_v1  ;;  %733 = vmatpush.msra.mxu2 %v708_v1 }
 0x1cc   : > { %2615 = vmatpush.msra.mxu3 %v707_v63  ;;  %734 = vmatpush.msra.mxu2 %v707_v63 }
 0x1cd   : > { %942 = vmatmul.f32.gmra.mxu1 %v559_v38  ;;  %v574_v38 = vpop.f32.mrf.mxu0 }
 0x1d5   : > { %945 = vmatmul.f32.gmra.mxu1 %v562_v25  ;;  %v706_v25 = vld [vmem:[#allocation10 + $0x18] sm:$0xff]  ;;  %v577_v55 = vpop.f32.mrf.mxu0 }
 0x1d6   : > { %2616 = vmatpush.msra.mxu3 %v706_v25  ;;  %735 = vmatpush.msra.mxu2 %v706_v25 }
 0x1d8   : > { %2617 = vmatpush.msra.mxu3 %v705_v61  ;;  %736 = vmatpush.msra.mxu2 %v705_v61 }
 0x1da   : > { %2618 = vmatpush.msra.mxu3 %v704_v39  ;;  %737 = vmatpush.msra.mxu2 %v704_v39 }
 0x1dc   : > { %2619 = vmatpush.msra.mxu3 %v703_v59  ;;  %738 = vmatpush.msra.mxu2 %v703_v59 }
 0x1dd   : > { %948 = vmatmul.f32.gmra.mxu1 %v565_v22  ;;  %799 = vmatmul.f32.vlgmr.msra.gmra.mxu3 %v3411_v16  ;;  %v580_v22 = vpop.f32.mrf.mxu0 }
 0x1de   : > { %739 = vmatmul.f32.vlgmr.msra.gmra.mxu2 %v3498_v56  ;;  %868 = vmatpush.msrb.mxu3 %v718_v18  ;;  %v2026_v18 = vld [vmem:[#allocation13 + $0x10] sm:$0xff] }
 0x1e0   : > { %869 = vmatpush.msrb.mxu3 %v717_v15 }
 0x1e2   : > { %870 = vmatpush.msrb.mxu3 %v716_v7  ;;  %v2032_v7 = vld [vmem:[#allocation13 + $0x40] sm:$0xff] }
 0x1e4   : > { %871 = vmatpush.msrb.mxu3 %v715_v13  ;;  %v2025_v13 = vld [vmem:[#allocation13 + $0x8] sm:$0xff] }
 0x1e5   : > { %951 = vmatmul.f32.gmra.mxu1 %v568_v31  ;;  %802 = vmatmul.f32.gmra.mxu3 %v3415_v19  ;;  %v583_v31 = vpop.f32.mrf.mxu0 }
 0x1e6   : > { %742 = vmatmul.f32.gmra.mxu2 %v3505_v58  ;;  %872 = vmatpush.msrb.mxu3 %v714_v11  ;;  %v2024_v11 = vld [vmem:[#allocation13] sm:$0xff] }
 0x1e8   : > { %873 = vmatpush.msrb.mxu3 %v713_v9 }
 0x1ea   : > { %874 = vmatpush.msrb.mxu3 %v712_v29  ;;  %v4363_v29 = vld [vmem:[#allocation29_spill] sm:$0xff] }
 0x1ec   : > { %875 = vmatpush.msrb.mxu3 %v711_v33 }
 0x1ed   : > { %954 = vmatmul.f32.gmra.mxu1 %v571_v5  ;;  %805 = vmatmul.f32.gmra.mxu3 %v3419_v21  ;;  %v586_v16 = vpop.f32.mrf.mxu0 }
 0x1ee   : > { %745 = vmatmul.f32.gmra.mxu2 %v3511_v60  ;;  %876 = vmatpush.msrb.mxu3 %v710_v36 }
 0x1f0   : > { %877 = vmatpush.msrb.mxu3 %v709_v3  ;;  %v4360_v3 = vld [vmem:[#allocation26_spill] sm:$0xff] }
 0x1f2   : > { %878 = vmatpush.msrb.mxu3 %v708_v1  ;;  %v2037_v1 = vld [vmem:[#allocation13 + $0x68] sm:$0xff] }
 0x1f4   : > { %879 = vmatpush.msrb.mxu3 %v707_v63 }
 0x1f5   : > { %957 = vmatmul.f32.gmra.mxu1 %v574_v38  ;;  %808 = vmatmul.f32.gmra.mxu3 %v3423_v23  ;;  %v589_v19 = vpop.f32.mrf.mxu0 }
 0x1f6   : > { %748 = vmatmul.f32.gmra.mxu2 %v3517_v62  ;;  %880 = vmatpush.msrb.mxu3 %v706_v25 }
 0x1f8   : > { %881 = vmatpush.msrb.mxu3 %v705_v61 }
 0x1fa   : > { %882 = vmatpush.msrb.mxu3 %v704_v39 }
 0x1fc   : > { %883 = vmatpush.msrb.mxu3 %v703_v59 }
 0x1fd   : > { %960 = vmatmul.f32.gmra.mxu1 %v577_v55  ;;  %811 = vmatmul.f32.gmra.mxu3 %v3427_v26  ;;  %v592_v21 = vpop.f32.mrf.mxu0 }
 0x1fe   : > { %751 = vmatmul.f32.gmra.mxu2 %v3523_v0  ;;  %v2038_v0 = vld [vmem:[#allocation13 + $0x70] sm:$0xff] }
 0x205   : > { %963 = vmatmul.f32.gmra.mxu1 %v580_v22  ;;  %814 = vmatmul.f32.gmra.mxu3 %v3431_v28  ;;  %v595_v23 = vpop.f32.mrf.mxu0  ;;  %v4364_v22 = vld [vmem:[#allocation30_spill] sm:$0xff] }
 0x206   : > { %754 = vmatmul.f32.gmra.mxu2 %v3529_v2  ;;  %v4358_v2 = vld [vmem:[#allocation24_spill] sm:$0xff] }
 0x20d   : > { %966 = vmatmul.f32.gmra.mxu1 %v583_v31  ;;  %817 = vmatmul.f32.gmra.mxu3 %v3435_v30  ;;  %v598_v26 = vpop.f32.mrf.mxu0 }
 0x20e   : > { %757 = vmatmul.f32.gmra.mxu2 %v3535_v4  ;;  %v2034_v4 = vld [vmem:[#allocation13 + $0x50] sm:$0xff] }
 0x215   : > { %969 = vmatmul.f32.gmra.mxu1 %v586_v16  ;;  %820 = vmatmul.f32.gmra.mxu3 %v3439_v35  ;;  %v601_v35 = vpop.f32.mrf.mxu0 }
 0x216   : > { %760 = vmatmul.f32.gmra.mxu2 %v3541_v6  ;;  %v2033_v6 = vld [vmem:[#allocation13 + $0x48] sm:$0xff] }
 0x21d   : > { %972 = vmatmul.f32.gmra.mxu1 %v589_v19  ;;  %823 = vmatmul.f32.gmra.mxu3 %v3443_v40  ;;  %v604_v56 = vpop.f32.mrf.mxu0 }
 0x21e   : > { %763 = vmatmul.f32.gmra.mxu2 %v3547_v8  ;;  %v4361_v8 = vld [vmem:[#allocation27_spill] sm:$0xff] }
 0x225   : > { %975 = vmatmul.f32.gmra.mxu1 %v592_v21  ;;  %826 = vmatmul.f32.gmra.mxu3 %v3447_v41  ;;  %v607_v60 = vpop.f32.mrf.mxu0 }
 0x226   : > { %766 = vmatmul.f32.gmra.mxu2 %v3551_v10  ;;  %v2031_v10 = vld [vmem:[#allocation13 + $0x38] sm:$0xff] }
 0x22d   : > { %978 = vmatmul.f32.gmra.mxu1 %v595_v23  ;;  %829 = vmatmul.f32.gmra.mxu3 %v3451_v42 }
 0x22e   : > { %769 = vmatmul.f32.gmra.mxu2 %v3555_v12 }
 0x232   : > { %v3612_v28 = vpop.f32.mrf.mxu1 }
 0x233   : > { %v1031_v30 = vsel %vm1030_vm0, %v3612_v28, -inf }
 0x234   : > { %1032 = vmax.xlane.f32.xlu0 %v1031_v30 }
 0x235   : > { %981 = vmatmul.f32.gmra.mxu1 %v598_v26  ;;  %832 = vmatmul.f32.gmra.mxu3 %v3455_v43 }
 0x236   : > { %772 = vmatmul.f32.gmra.mxu2 %v3559_v14  ;;  %v2030_v14 = vld [vmem:[#allocation13 + $0x30] sm:$0xff] }
 0x23a   : > { %v3618_v55 = vpop.f32.mrf.mxu1 }
 0x23b   : > { %v1034_v40 = vsel %vm1030_vm0, %v3618_v55, -inf }
 0x23c   : > { %1035 = vmax.xlane.f32.xlu0 %v1034_v40  ;;  %v4365_v40 = vld [vmem:[#allocation31_spill] sm:$0xff] }
 0x23d   : > { %984 = vmatmul.f32.gmra.mxu1 %v601_v35  ;;  %884 = vmatmul.f32.vlgmr.msrb.gmra.mxu3 %v3459_v44 }
 0x23e   : > { %775 = vmatmul.f32.gmra.mxu2 %v3563_v17  ;;  %v3687_v17 = vld [vmem:[%s4312_s5] ss:$0 sm:$0xff] }
 0x242   : > { %v3624_v58 = vpop.f32.mrf.mxu1 }
 0x243   : > { %v1037_v41 = vsel %vm1030_vm0, %v3624_v58, -inf }
 0x244   : > { %1038 = vmax.xlane.f32.xlu1 %v1037_v41 }
 0x245   : > { %987 = vmatmul.f32.gmra.mxu1 %v604_v56  ;;  %887 = vmatmul.f32.gmra.mxu3 %v3463_v45 }
 0x246   : > { %778 = vmatmul.f32.gmra.mxu2 %v3567_v20  ;;  %v2029_v20 = vld [vmem:[#allocation13 + $0x28] sm:$0xff] }
 0x24a   : > { %v3630_v59 = vpop.f32.mrf.mxu1 }
 0x24b   : > { %v1040_v42 = vsel %vm1030_vm0, %v3630_v59, -inf }
 0x24c   : > { %1041 = vmax.xlane.f32.xlu1 %v1040_v42 }
 0x24d   : > { %990 = vmatmul.f32.gmra.mxu1 %v607_v60  ;;  %890 = vmatmul.f32.gmra.mxu3 %v3467_v46 }
 0x24e   : > { %781 = vmatmul.f32.gmra.mxu2 %v3571_v24  ;;  %v2028_v24 = vld [vmem:[#allocation13 + $0x20] sm:$0xff] }
 0x252   : > { %v3636_v61 = vpop.f32.mrf.mxu1 }
 0x253   : > { %v1043_v43 = vsel %vm1030_vm0, %v3636_v61, -inf }
 0x254   : > { %1044 = vmax.xlane.f32.xlu2 %v1043_v43 }
 0x255   : > { %993 = vmatmul.f32.gmra.mxu1 %v3474_v48  ;;  %893 = vmatmul.f32.gmra.mxu3 %v3471_v47 }
 0x256   : > { %784 = vmatmul.f32.gmra.mxu2 %v3575_v27 }
 0x25a   : > { %v3643_v62 = vpop.f32.mrf.mxu1 }
 0x25b   : > { %v1046_v44 = vsel %vm1030_vm0, %v3643_v62, -inf }
 0x25c   : > { %1047 = vmax.xlane.f32.xlu2 %v1046_v44 }
 0x25d   : > { %996 = vmatmul.f32.gmra.mxu1 %v3480_v50  ;;  %896 = vmatmul.f32.gmra.mxu3 %v3477_v49  ;;  %v4357_v49 = vld [vmem:[#allocation25_spill] sm:$0xff] }
 0x25e   : > { %787 = vmatmul.f32.gmra.mxu2 %v3579_v32  ;;  %v4362_v32 = vld [vmem:[#allocation28_spill] sm:$0xff] }
 0x260   : > { %v3664_v50 = vpop.f32.mrf.mxu3 }
 0x261   : > { %v740_v27 = vpop.f32.mrf.mxu2 }
 0x262   : > { %v3650_v63 = vpop.f32.mrf.mxu1  ;;  %v741_v39 = vadd.f32 %v3687_v17, %v740_v27 }
 0x263   : > { %v1049_v45 = vsel %vm1030_vm0, %v3650_v63, -inf }
 0x264   : > { %1050 = vmax.xlane.f32.xlu0 %v1049_v45  ;;  %v836_v15 = vmax.f32 %v741_v39, 0.0 }
 0x265   : > { %999 = vmatmul.f32.gmra.mxu1 %v3486_v52  ;;  %899 = vmatmul.f32.gmra.mxu3 %v3483_v51  ;;  %v2039_v52 = vld [vmem:[#allocation13 + $0x78] sm:$0xff]  ;;  %v2036_v51 = vld [vmem:[#allocation13 + $0x60] sm:$0xff] }
 0x266   : > { %790 = vmatmul.f32.gmra.mxu2 %v3583_v34  ;;  %2040 = vmatpush.msrb.mxu0 %v2039_v52  ;;  %v2027_v34 = vld [vmem:[#allocation13 + $0x18] sm:$0xff] }
 0x268   : > { %v3669_v47 = vpop.f32.mrf.mxu3  ;;  %2041 = vmatpush.msrb.mxu0 %v2038_v0 }
 0x269   : > { %v743_v9 = vpop.f32.mrf.mxu2 }
 0x26a   : > { %v3657_v48 = vpop.f32.mrf.mxu1  ;;  %2042 = vmatpush.msrb.mxu0 %v2037_v1  ;;  %v744_v36 = vadd.f32 %v3687_v17, %v743_v9 }
 0x26b   : > { %v1052_v46 = vsel %vm1030_vm0, %v3657_v48, -inf }
 0x26c   : > { %1053 = vmax.xlane.f32.xlu2 %v1052_v46  ;;  %2043 = vmatpush.msrb.mxu0 %v2036_v51  ;;  %v837_v38 = vmax.f32 %v744_v36, 0.0 }
 0x26d   : > { %1002 = vmatmul.f32.gmra.mxu1 %v3492_v54  ;;  %902 = vmatmul.f32.gmra.mxu3 %v3489_v53  ;;  %v2035_v53 = vld [vmem:[#allocation13 + $0x58] sm:$0xff] }
 0x26e   : > { %793 = vmatmul.f32.gmra.mxu2 %v3587_v37  ;;  %2044 = vmatpush.msrb.mxu0 %v2035_v53 }
 0x270   : > { %v3674_v54 = vpop.f32.mrf.mxu3  ;;  %2045 = vmatpush.msrb.mxu0 %v2034_v4 }
 0x271   : > { %v746_v25 = vpop.f32.mrf.mxu2 }
 0x272   : > { %2046 = vmatpush.msrb.mxu0 %v2033_v6  ;;  %v747_v21 = vadd.f32 %v3687_v17, %v746_v25  ;;  %v3702_v23 = vpop.f32.mrf.mxu1 }
 0x273   : > { %v1055_v51 = vsel %vm1030_vm0, %v3702_v23, -inf }
 0x274   : > { %2047 = vmatpush.msrb.mxu0 %v2032_v7  ;;  %v838_v30 = vmax.f32 %v747_v21, 0.0 }
 0x275   : > { %1005 = vmatmul.f32.gmra.mxu1 %v3502_v57  ;;  %905 = vmatmul.f32.gmra.mxu3 %v4358_v2  ;;  %v4359_v57 = vld [vmem:[#allocation32_spill] sm:$0xff] }
 0x276   : > { %796 = vmatmul.f32.gmra.mxu2 %v4359_v57  ;;  %2048 = vmatpush.msrb.mxu0 %v2031_v10 }
 0x278   : > { %v3679_v5 = vpop.f32.mrf.mxu3  ;;  %2049 = vmatpush.msrb.mxu0 %v2030_v14 }
 0x279   : > { %v749_v35 = vpop.f32.mrf.mxu2 }
 0x27a   : > { %2050 = vmatpush.msrb.mxu0 %v2029_v20  ;;  %v750_v42 = vadd.f32 %v3687_v17, %v749_v35  ;;  %v3713_v45 = vpop.f32.mrf.mxu1 }
 0x27b   : > { %v1058_v14 = vsel %vm1030_vm0, %v3713_v45, -inf }
 0x27c   : > { %2051 = vmatpush.msrb.mxu0 %v2028_v24  ;;  %v839_v46 = vmax.f32 %v750_v42, 0.0 }
 0x27d   : > { %1008 = vmatmul.f32.gmra.mxu1 %v4357_v49 }
 0x27e   : > { %2052 = vmatpush.msrb.mxu0 %v2027_v34 }
 0x280   : > { %v3682_v12 = vpop.f32.mrf.mxu3  ;;  %2053 = vmatpush.msrb.mxu0 %v2026_v18 }
 0x281   : > { %v752_v49 = vpop.f32.mrf.mxu2 }
 0x282   : > { %2054 = vmatpush.msrb.mxu0 %v2025_v13  ;;  %v753_v1 = vadd.f32 %v3687_v17, %v752_v49  ;;  %v3725_v6 = vpop.f32.mrf.mxu1 }
 0x284   : > { %2055 = vmatpush.msrb.mxu0 %v2024_v11  ;;  %v840_v53 = vmax.f32 %v753_v1, 0.0  ;;  %v1061_v11 = vsel %vm1030_vm0, %v3725_v6, -inf }
 0x285   : > { %1011 = vmatmul.f32.gmra.mxu1 %v4360_v3  ;;  %2056 = vmatmul.f32.vlgmr.msrb.gmra.mxu0 %v836_v15 }
 0x288   : > { %v3690_v37 = vpop.f32.mrf.mxu3 }
 0x289   : > { %v755_v4 = vpop.f32.mrf.mxu2 }
 0x28a   : > { %v756_v10 = vadd.f32 %v3687_v17, %v755_v4  ;;  %v3739_v18 = vpop.f32.mrf.mxu1 }
 0x28b   : > { %v1064_v21 = vsel %vm1030_vm0, %v3739_v18, -inf }
 0x28d   : > { %1014 = vmatmul.f32.gmra.mxu1 %v4361_v8  ;;  %2059 = vmatmul.f32.gmra.mxu0 %v837_v38 }
 0x290   : > { %v3694_v33 = vpop.f32.mrf.mxu3 }
 0x291   : > { %v758_v34 = vpop.f32.mrf.mxu2 }
 0x292   : > { %v759_v13 = vadd.f32 %v3687_v17, %v758_v34 }
 0x294   : > { %v842_v38 = vmax.f32 %v759_v13, 0.0 }
 0x295   : > { %1017 = vmatmul.f32.gmra.mxu1 %v4362_v32  ;;  %2062 = vmatmul.f32.gmra.mxu0 %v838_v30  ;;  %v841_v32 = vmax.f32 %v756_v10, 0.0  ;;  %v3757_v30 = vpop.f32.mrf.mxu1 }
 0x298   : > { %v3698_v31 = vpop.f32.mrf.mxu3 }
 0x299   : > { %v761_v25 = vpop.f32.mrf.mxu2 }
 0x29d   : > { %1020 = vmatmul.f32.gmra.mxu1 %v4363_v29  ;;  %2065 = vmatmul.f32.gmra.mxu0 %v839_v46  ;;  %v1067_v46 = vsel %vm1030_vm0, %v3757_v30, -inf  ;;  %v3771_v1 = vpop.f32.mrf.mxu1 }
 0x2a0   : > { %v3705_v56 = vpop.f32.mrf.mxu3 }
 0x2a5   : > { %1023 = vmatmul.f32.gmra.mxu1 %v4364_v22  ;;  %2068 = vmatmul.f32.gmra.mxu0 %v840_v53 }
 0x2a7   : > { %v1033_v16 = vpop.xlane.xlu0 %1032 }
 0x2a8   : > { %v1127_v19 = vsub.f32 %v3612_v28, %v1033_v16  ;;  %v3715_v52 = vpop.f32.mrf.mxu3 }
 0x2aa   : > { %v1159_v26 = vmul.f32 1.442695, %v1127_v19  ;;  %v762_v19 = vadd.f32 %v3687_v17, %v761_v25 }
 0x2ac   : > { %2728 = vpow2.f32 %v1159_v26 }
 0x2ad   : > { %1026 = vmatmul.f32.gmra.mxu1 %v4365_v40  ;;  %2071 = vmatmul.f32.gmra.mxu0 %v841_v32  ;;  %v3781_v32 = vpop.f32.mrf.mxu1 }
 0x2af   : > { %v1036_v41 = vpop.xlane.xlu0 %1035 }
 0x2b0   : > { %v1128_v60 = vsub.f32 %v3618_v55, %v1036_v41  ;;  %v843_v41 = vmax.f32 %v762_v19, 0.0 }
 0x2b2   : > { %v3709_v28 = vpop.eup %2728  ;;  %v1161_v43 = vmul.f32 1.442695, %v1128_v60  ;;  %v764_v60 = vpop.f32.mrf.mxu2 }
 0x2b3   : > { %v1223_v44 = vsel %vm1030_vm0, %v3709_v28, 0.0 }
 0x2b4   : > { %2730 = vpow2.f32 %v1161_v43  ;;  %1224 = vadd.xlane.f32.xlu1 %v1223_v44  ;;  %v765_v44 = vadd.f32 %v3687_v17, %v764_v60 }
 0x2b5   : > { %2074 = vmatmul.f32.gmra.mxu0 %v842_v38  ;;  %v3790_v38 = vpop.f32.mrf.mxu1 }
 0x2b7   : > { %v1039_v0 = vpop.xlane.xlu1 %1038 }
 0x2b8   : > { %v1129_v55 = vsub.f32 %v3624_v58, %v1039_v0  ;;  %v3727_v58 = vpop.f32.mrf.mxu3 }
 0x2ba   : > { %v3721_v2 = vpop.eup %2730  ;;  %v1163_v57 = vmul.f32 1.442695, %v1129_v55 }
 0x2bb   : > { %v1226_v3 = vsel %vm1030_vm0, %v3721_v2, 0.0 }
 0x2bc   : > { %2732 = vpow2.f32 %v1163_v57  ;;  %1227 = vadd.xlane.f32.xlu0 %v1226_v3  ;;  %1056 = vmax.xlane.f32.xlu1 %v1055_v51  ;;  %v844_v51 = vmax.f32 %v765_v44, 0.0  ;;  %v767_v57 = vpop.f32.mrf.mxu2 }
 0x2bd   : > { %2077 = vmatmul.f32.gmra.mxu0 %v843_v41  ;;  %v768_v4 = vadd.f32 %v3687_v17, %v767_v57 }
 0x2bf   : > { %v1042_v7 = vpop.xlane.xlu1 %1041 }
 0x2c0   : > { %v1130_v8 = vsub.f32 %v3630_v59, %v1042_v7  ;;  %v3737_v39 = vpop.f32.mrf.mxu3  ;;  %v1070_v7 = vsel %vm1030_vm0, %v3771_v1, -inf }
 0x2c2   : > { %v3733_v20 = vpop.eup %2732  ;;  %v1165_v24 = vmul.f32 1.442695, %v1130_v8 }
 0x2c3   : > { %v1229_v27 = vsel %vm1030_vm0, %v3733_v20, 0.0 }
 0x2c4   : > { %2734 = vpow2.f32 %v1165_v24  ;;  %1230 = vadd.xlane.f32.xlu2 %v1229_v27  ;;  %1059 = vmax.xlane.f32.xlu0 %v1058_v14  ;;  %v845_v24 = vmax.f32 %v768_v4, 0.0  ;;  %v770_v27 = vpop.f32.mrf.mxu2 }
 0x2c5   : > { %2080 = vmatmul.f32.gmra.mxu0 %v844_v51  ;;  %v771_v34 = vadd.f32 %v3687_v17, %v770_v27 }
 0x2c7   : > { %v1045_v59 = vpop.xlane.xlu2 %1044 }
 0x2c8   : > { %v1131_v15 = vsub.f32 %v3636_v61, %v1045_v59  ;;  %v3749_v22 = vpop.f32.mrf.mxu3  ;;  %v1073_v59 = vsel %vm1030_vm0, %v3781_v32, -inf }
 0x2ca   : > { %v3745_v9 = vpop.eup %2734  ;;  %v1167_v29 = vmul.f32 1.442695, %v1131_v15 }
 0x2cb   : > { %v1232_v36 = vsel %vm1030_vm0, %v3745_v9, 0.0 }
 0x2cc   : > { %2736 = vpow2.f32 %v1167_v29  ;;  %1233 = vadd.xlane.f32.xlu1 %v1232_v36  ;;  %1062 = vmax.xlane.f32.xlu2 %v1061_v11  ;;  %v846_v11 = vmax.f32 %v771_v34, 0.0  ;;  %v773_v29 = vpop.f32.mrf.mxu2 }
 0x2cd   : > { %2083 = vmatmul.f32.gmra.mxu0 %v845_v24  ;;  %v774_v25 = vadd.f32 %v3687_v17, %v773_v29 }
 0x2cf   : > { %v1048_v61 = vpop.xlane.xlu2 %1047 }
 0x2d0   : > { %v1132_v16 = vsub.f32 %v3643_v62, %v1048_v61  ;;  %v3761_v62 = vpop.f32.mrf.mxu3  ;;  %v1076_v61 = vsel %vm1030_vm0, %v3790_v38, -inf }
 0x2d1   : > { %v889_v34 = vadd.f32 %v3687_v17, %v3761_v62 }
 0x2d2   : > { %v3755_v26 = vpop.eup %2736  ;;  %v1169_v35 = vmul.f32 1.442695, %v1132_v16  ;;  %v847_v16 = vmax.f32 %v774_v25, 0.0 }
 0x2d3   : > { %v1235_v40 = vsel %vm1030_vm0, %v3755_v26, 0.0  ;;  %v910_v29 = vmax.f32 %v889_v34, 0.0 }
 0x2d4   : > { %2738 = vpow2.f32 %v1169_v35  ;;  %1236 = vadd.xlane.f32.xlu0 %v1235_v40  ;;  %1065 = vmax.xlane.f32.xlu1 %v1064_v21  ;;  %v776_v19 = vpop.f32.mrf.mxu2 }
 0x2d5   : > { %2086 = vmatmul.f32.gmra.mxu0 %v846_v11  ;;  %v777_v35 = vadd.f32 %v3687_v17, %v776_v19 }
 0x2d7   : > { %v1051_v42 = vpop.xlane.xlu0 %1050  ;;  %v848_v40 = vmax.f32 %v777_v35, 0.0 }
 0x2d8   : > { %v1133_v43 = vsub.f32 %v3650_v63, %v1051_v42  ;;  %v891_v63 = vpop.f32.mrf.mxu3 }
 0x2d9   : > { %v892_v24 = vadd.f32 %v3687_v17, %v891_v63 }
 0x2da   : > { %v3767_v49 = vpop.eup %2738  ;;  %v1171_v0 = vmul.f32 1.442695, %v1133_v43 }
 0x2db   : > { %v1238_v55 = vsel %vm1030_vm0, %v3767_v49, 0.0  ;;  %v911_v11 = vmax.f32 %v892_v24, 0.0 }
 0x2dc   : > { %2740 = vpow2.f32 %v1171_v0  ;;  %1239 = vadd.xlane.f32.xlu2 %v1238_v55  ;;  %1068 = vmax.xlane.f32.xlu0 %v1067_v46  ;;  %v779_v41 = vpop.f32.mrf.mxu2 }
 0x2dd   : > { %2089 = vmatmul.f32.gmra.mxu0 %v847_v16  ;;  %v780_v42 = vadd.f32 %v3687_v17, %v779_v41 }
 0x2df   : > { %v1054_v3 = vpop.xlane.xlu2 %1053  ;;  %v849_v43 = vmax.f32 %v780_v42, 0.0 }
 0x2e0   : > { %v1134_v53 = vsub.f32 %v3657_v48, %v1054_v3  ;;  %v894_v48 = vpop.f32.mrf.mxu3 }
 0x2e2   : > { %v3777_v8 = vpop.eup %2740  ;;  %v1173_v10 = vmul.f32 1.442695, %v1134_v53 }
 0x2e3   : > { %v1241_v14 = vsel %vm1030_vm0, %v3777_v8, 0.0 }
 0x2e4   : > { %2742 = vpow2.f32 %v1173_v10  ;;  %1242 = vadd.xlane.f32.xlu1 %v1241_v14  ;;  %1071 = vmax.xlane.f32.xlu2 %v1070_v7  ;;  %v782_v46 = vpop.f32.mrf.mxu2  ;;  %v895_v7 = vadd.f32 %v3687_v17, %v894_v48 }
 0x2e5   : > { %2092 = vmatmul.f32.gmra.mxu0 %v848_v40  ;;  %v783_v57 = vadd.f32 %v3687_v17, %v782_v46 }
 0x2e7   : > { %v850_v14 = vmax.f32 %v783_v57, 0.0 }
 0x2e8   : > { %v897_v36 = vpop.f32.mrf.mxu3 }
 0x2e9   : > { %v898_v3 = vadd.f32 %v3687_v17, %v897_v36 }
 0x2ea   : > { %v3786_v15 = vpop.eup %2742 }
 0x2eb   : > { %v1244_v13 = vsel %vm1030_vm0, %v3786_v15, 0.0  ;;  %v913_v27 = vmax.f32 %v898_v3, 0.0 }
 0x2ec   : > { %1245 = vadd.xlane.f32.xlu0 %v1244_v13  ;;  %1074 = vmax.xlane.f32.xlu1 %v1073_v59  ;;  %v912_v59 = vmax.f32 %v895_v7, 0.0  ;;  %v886_v13 = vadd.f32 %v3687_v17, %v3749_v22  ;;  %v785_v36 = vpop.f32.mrf.mxu2 }
 0x2ed   : > { %2095 = vmatmul.f32.gmra.mxu0 %v849_v43  ;;  %v786_v63 = vadd.f32 %v3687_v17, %v785_v36 }
 0x2ee   : > { %v909_v48 = vmax.f32 %v886_v13, 0.0 }
 0x2ef   : > { %v851_v25 = vmax.f32 %v786_v63, 0.0 }
 0x2f0   : > { %v900_v21 = vpop.f32.mrf.mxu3 }
 0x2f1   : > { %v901_v55 = vadd.f32 %v3687_v17, %v900_v21 }
 0x2f3   : > { %v914_v10 = vmax.f32 %v901_v55, 0.0  ;;  %v3813_v55 = vpop.f32.mrf.mxu1 }
 0x2f4   : > { %1077 = vmax.xlane.f32.xlu0 %v1076_v61  ;;  %v788_v62 = vpop.f32.mrf.mxu2 }
 0x2f5   : > { %2098 = vmatmul.f32.gmra.mxu0 %v850_v14  ;;  %v789_v61 = vadd.f32 %v3687_v17, %v788_v62 }
 0x2f7   : > { %v852_v16 = vmax.f32 %v789_v61, 0.0 }
 0x2f8   : > { %v903_v60 = vpop.f32.mrf.mxu3 }
 0x2f9   : > { %v904_v44 = vadd.f32 %v3687_v17, %v903_v60 }
 0x2fb   : > { %v915_v53 = vmax.f32 %v904_v44, 0.0 }
 0x2fc   : > { %v791_v22 = vpop.f32.mrf.mxu2 }
 0x2fd   : > { %2101 = vmatmul.f32.gmra.mxu0 %v851_v25  ;;  %v792_v21 = vadd.f32 %v3687_v17, %v791_v22 }
 0x2ff   : > { %v853_v35 = vmax.f32 %v792_v21, 0.0 }
 0x300   : > { %v906_v0 = vpop.f32.mrf.mxu3 }
 0x301   : > { %v907_v51 = vadd.f32 %v3687_v17, %v906_v0 }
 0x303   : > { %v916_v4 = vmax.f32 %v907_v51, 0.0 }
 0x304   : > { %v794_v44 = vpop.f32.mrf.mxu2 }
 0x305   : > { %1903 = vmatpush.msra.mxu3 %v916_v4  ;;  %2104 = vmatmul.f32.gmra.mxu0 %v852_v16  ;;  %v795_v0 = vadd.f32 %v3687_v17, %v794_v44 }
 0x307   : > { %1904 = vmatpush.msra.mxu3 %v915_v53  ;;  %v854_v4 = vmax.f32 %v795_v0, 0.0 }
 0x309   : > { %1905 = vmatpush.msra.mxu3 %v914_v10 }
 0x30b   : > { %1906 = vmatpush.msra.mxu3 %v913_v27 }
 0x30c   : > { %v797_v13 = vpop.f32.mrf.mxu2 }
 0x30d   : > { %1907 = vmatpush.msra.mxu3 %v912_v59  ;;  %2107 = vmatmul.f32.gmra.mxu0 %v853_v35  ;;  %v798_v25 = vadd.f32 %v3687_v17, %v797_v13  ;;  %v801_v35 = vadd.f32 %v3687_v17, %v3664_v50 }
 0x30f   : > { %1908 = vmatpush.msra.mxu3 %v911_v11  ;;  %v856_v50 = vmax.f32 %v801_v35, 0.0  ;;  %v807_v35 = vadd.f32 %v3687_v17, %v3674_v54 }
 0x311   : > { %1909 = vmatpush.msra.mxu3 %v910_v29 }
 0x313   : > { %1910 = vmatpush.msra.mxu3 %v909_v48 }
 0x315   : > { %2110 = vmatmul.f32.gmra.mxu0 %v854_v4 }
 0x327   : > { %v1225_v19 = vpop.xlane.xlu1 %1224 }
 0x328   : > { %2744 = vrcp.f32 %v1225_v19  ;;  %v1330_v51 = vand.u32 2147483648, %v1225_v19  ;;  %v1328_v53 = vand.u32 2147483647, %v1225_v19  ;;  %vm1324_vm2 = vweird.f32 %v1225_v19 }
 0x32a   : > { %v1331_v14 = vor.u32 1.1754944e-38, %v1330_v51  ;;  %vm1329_vm4 = vcmp.eq.f32.partialorder %v1328_v53, 8.507059e+37  ;;  %v1079_v51 = vsel %vm1030_vm0, %v3813_v55, -inf }
 0x32e   : > { %v2745_v40 = vpop.eup %2744 }
 0x32f   : > { %v1320_v41 = vmul.f32 %v2745_v40, %v1225_v19  ;;  %v1228_v60 = vpop.xlane.xlu0 %1227  ;;  %v1057_v42 = vpop.xlane.xlu1 %1056  ;;  %vm1325_vm1 = vweird.f32 %v2745_v40 }
 0x330   : > { %2746 = vrcp.f32 %v1228_v60  ;;  %v1135_v43 = vsub.f32 %v3702_v23, %v1057_v42  ;;  %vm1326_vm3 = vmor %vm1324_vm2, %vm1325_vm1  ;;  %v1345_v63 = vand.u32 2147483648, %v1228_v60  ;;  %v3826_v19 = vpop.f32.mrf.mxu1  ;;  %v1343_v22 = vand.u32 2147483647, %v1228_v60 }
 0x331   : > { %v1321_v46 = vsub.f32 1.0, %v1320_v41  ;;  %vm1339_vm6 = vweird.f32 %v1228_v60 }
 0x332   : > { %v1175_v57 = vmul.f32 1.442695, %v1135_v43  ;;  %vm1344_vm8 = vcmp.eq.f32.partialorder %v1343_v22, 8.507059e+37 }
 0x333   : > { %v1322_v3 = vmul.f32 %v2745_v40, %v1321_v46 }
 0x334   : > { %2748 = vpow2.f32 %v1175_v57 }
 0x335   : > { %v1323_v7 = vadd.f32 %v2745_v40, %v1322_v3 }
 0x336   : > { %v2747_v10 = vpop.eup %2746 }
 0x337   : > { %v1327_v23 = vsel %vm1326_vm3, %v2745_v40, %v1323_v7  ;;  %v1335_v24 = vmul.f32 %v2747_v10, %v1228_v60  ;;  %v3815_v27 = vpop.xlane.xlu2 %1230  ;;  %v1060_v34 = vpop.xlane.xlu0 %1059  ;;  %vm1340_vm5 = vweird.f32 %v2747_v10  ;;  %v1346_v40 = vor.u32 1.1754944e-38, %v1345_v63 }
 0x338   : > { %v1332_v59 = vsel %vm1329_vm4, %v1331_v14, %v1327_v23  ;;  %2750 = vrcp.f32 %v3815_v27  ;;  %v1136_v29 = vsub.f32 %v3713_v45, %v1060_v34  ;;  %v855_v45 = vmax.f32 %v798_v25, 0.0  ;;  %vm1341_vm7 = vmor %vm1339_vm6, %vm1340_vm5 }
 0x339   : > { %v1336_v11 = vsub.f32 1.0, %v1335_v24  ;;  %v1333_v48 = vmul.f32 %v3709_v28, %v1332_v59  ;;  %v1360_v7 = vand.u32 2147483648, %v3815_v27  ;;  %vm1354_vm10 = vweird.f32 %v3815_v27  ;;  %v3848_v24 = vpop.f32.mrf.mxu1 }
 0x33a   : > { %v3820_v36 = vpop.eup %2748  ;;  %v1177_v61 = vmul.f32 1.442695, %v1136_v29  ;;  %2113 = vmatmul.f32.gmra.mxu0 %v855_v45  ;;  %v804_v23 = vadd.f32 %v3687_v17, %v3669_v47  ;;  %v1085_v54 = vsel %vm1030_vm0, %v3848_v24, -inf }
 0x33b   : > { %v1337_v62 = vmul.f32 %v2747_v10, %v1336_v11  ;;  %2548 = vmatmul.msk.f32.vlgmr.msra.gmra.mxu3 %vm1030_vm0, %v1333_v48  ;;  %v1247_v16 = vsel %vm1030_vm0, %v3820_v36, 0.0  ;;  %v1361_v34 = vor.u32 1.1754944e-38, %v1360_v7 }
 0x33c   : > { %1248 = vadd.xlane.f32.xlu2 %v1247_v16  ;;  %2752 = vpow2.f32 %v1177_v61  ;;  %v857_v47 = vmax.f32 %v804_v23, 0.0  ;;  %v1082_v16 = vsel %vm1030_vm0, %v3826_v19, -inf }
 0x33d   : > { %v1338_v28 = vadd.f32 %v2747_v10, %v1337_v62 }
 0x33e   : > { %v2751_v21 = vpop.eup %2750 }
 0x33f   : > { %v1350_v41 = vmul.f32 %v2751_v21, %v3815_v27  ;;  %v3831_v42 = vpop.xlane.xlu1 %1233  ;;  %v1063_v43 = vpop.xlane.xlu2 %1062  ;;  %v1342_v44 = vsel %vm1341_vm7, %v2747_v10, %v1338_v28  ;;  %vm1355_vm9 = vweird.f32 %v2751_v21  ;;  %v1358_v10 = vand.u32 2147483647, %v3815_v27 }
 0x340   : > { %2754 = vrcp.f32 %v3831_v42  ;;  %v1137_v46 = vsub.f32 %v3725_v6, %v1063_v43  ;;  %v1347_v0 = vsel %vm1344_vm8, %v1346_v40, %v1342_v44  ;;  %vm1356_vm11 = vmor %vm1354_vm10, %vm1355_vm9  ;;  %v1375_v62 = vand.u32 2147483648, %v3831_v42 }
 0x341   : > { %v1351_v60 = vsub.f32 1.0, %v1350_v41  ;;  %v1348_v3 = vmul.f32 %v3721_v2, %v1347_v0  ;;  %vm1359_vm12 = vcmp.eq.f32.partialorder %v1358_v10, 8.507059e+37  ;;  %vm1369_vm14 = vweird.f32 %v3831_v42 }
 0x342   : > { %v1179_v57 = vmul.f32 1.442695, %v1137_v46  ;;  %v3838_v53 = vpop.eup %2752  ;;  %2116 = vmatmul.f32.gmra.mxu0 %v856_v50  ;;  %v1376_v40 = vor.u32 1.1754944e-38, %v1375_v62  ;;  %v858_v50 = vmax.f32 %v807_v35, 0.0 }
 0x343   : > { %v1352_v4 = vmul.f32 %v2751_v21, %v1351_v60  ;;  %2549 = vmatmul.msk.f32.gmra.mxu3 %vm1030_vm0, %v1348_v3  ;;  %v1250_v6 = vsel %vm1030_vm0, %v3838_v53, 0.0  ;;  %v3871_v60 = vpop.f32.mrf.mxu1 }
 0x344   : > { %2756 = vpow2.f32 %v1179_v57  ;;  %1080 = vmax.xlane.f32.xlu2 %v1079_v51  ;;  %1251 = vadd.xlane.f32.xlu1 %v1250_v6 }
 0x345   : > { %v1353_v14 = vadd.f32 %v2751_v21, %v1352_v4 }
 0x346   : > { %v2755_v2 = vpop.eup %2754 }
 0x347   : > { %v1365_v59 = vmul.f32 %v2755_v2, %v3831_v42  ;;  %v3851_v13 = vpop.xlane.xlu0 %1236  ;;  %v1066_v11 = vpop.xlane.xlu1 %1065  ;;  %v1357_v29 = vsel %vm1356_vm11, %v2751_v21, %v1353_v14  ;;  %vm1370_vm13 = vweird.f32 %v2755_v2 }
 0x348   : > { %2758 = vrcp.f32 %v3851_v13  ;;  %v1138_v48 = vsub.f32 %v3739_v18, %v1066_v11  ;;  %v1362_v63 = vsel %vm1359_vm12, %v1361_v34, %v1357_v29  ;;  %v1373_v18 = vand.u32 2147483647, %v3831_v42  ;;  %vm1371_vm15 = vmor %vm1369_vm14, %vm1370_vm13 }
 0x349   : > { %v1366_v27 = vsub.f32 1.0, %v1365_v59  ;;  %v1363_v61 = vmul.f32 %v3733_v20, %v1362_v63  ;;  %v1390_v7 = vand.u32 2147483648, %v3851_v13  ;;  %v1388_v10 = vand.u32 2147483647, %v3851_v13 }
 0x34a   : > { %v3855_v25 = vpop.eup %2756  ;;  %v1181_v45 = vmul.f32 1.442695, %v1138_v48  ;;  %2119 = vmatmul.f32.gmra.mxu0 %v857_v47  ;;  %vm1374_vm1 = vcmp.eq.f32.partialorder %v1373_v18, 8.507059e+37  ;;  %vm1384_vm3 = vweird.f32 %v3851_v13 }
 0x34b   : > { %v1367_v22 = vmul.f32 %v2755_v2, %v1366_v27  ;;  %v1253_v28 = vsel %vm1030_vm0, %v3855_v25, 0.0  ;;  %2550 = vmatmul.msk.f32.gmra.mxu3 %vm1030_vm0, %v1363_v61  ;;  %v1391_v23 = vor.u32 1.1754944e-38, %v1390_v7  ;;  %v3891_v27 = vpop.f32.mrf.mxu0  ;;  %vm1389_vm5 = vcmp.eq.f32.partialorder %v1388_v10, 8.507059e+37 }
 0x34c   : > { %1254 = vadd.xlane.f32.xlu0 %v1253_v28  ;;  %2760 = vpow2.f32 %v1181_v45  ;;  %1083 = vmax.xlane.f32.xlu1 %v1082_v16  ;;  %v1088_v61 = vsel %vm1030_vm0, %v3871_v60, -inf }
 0x34d   : > { %v1368_v21 = vadd.f32 %v2755_v2, %v1367_v22 }
 0x34e   : > { %v2759_v20 = vpop.eup %2758 }
 0x34f   : > { %v1380_v41 = vmul.f32 %v2759_v20, %v3851_v13  ;;  %v3869_v43 = vpop.xlane.xlu2 %1239  ;;  %v1069_v44 = vpop.xlane.xlu0 %1068  ;;  %v1372_v46 = vsel %vm1371_vm15, %v2755_v2, %v1368_v21  ;;  %vm1385_vm2 = vweird.f32 %v2759_v20  ;;  %v810_v2 = vadd.f32 %v3687_v17, %v3679_v5 }
 0x350   : > { %2762 = vrcp.f32 %v3869_v43  ;;  %v1139_v0 = vsub.f32 %v3757_v30, %v1069_v44  ;;  %v1377_v51 = vsel %vm1374_vm1, %v1376_v40, %v1372_v46  ;;  %vm1386_vm4 = vmor %vm1384_vm3, %vm1385_vm2  ;;  %v3895_v5 = vpop.f32.mrf.mxu1  ;;  %v1405_v45 = vand.u32 2147483648, %v3869_v43 }
 0x351   : > { %v1381_v42 = vsub.f32 1.0, %v1380_v41  ;;  %v1378_v57 = vmul.f32 %v3745_v9, %v1377_v51  ;;  %v859_v47 = vmax.f32 %v810_v2, 0.0  ;;  %v1403_v18 = vand.u32 2147483647, %v3869_v43 }
 0x352   : > { %v3878_v3 = vpop.eup %2760  ;;  %v1183_v6 = vmul.f32 1.442695, %v1139_v0  ;;  %2122 = vmatmul.f32.gmra.mxu0 %v858_v50  ;;  %vm1399_vm7 = vweird.f32 %v3869_v43  ;;  %v1406_v35 = vor.u32 1.1754944e-38, %v1405_v45 }
 0x353   : > { %v1382_v4 = vmul.f32 %v2759_v20, %v1381_v42  ;;  %2551 = vmatmul.msk.f32.gmra.mxu3 %vm1030_vm0, %v1378_v57  ;;  %v1256_v30 = vsel %vm1030_vm0, %v3878_v3, 0.0  ;;  %vm1404_vm9 = vcmp.eq.f32.partialorder %v1403_v18, 8.507059e+37 }
 0x354   : > { %1086 = vmax.xlane.f32.xlu0 %v1085_v54  ;;  %2764 = vpow2.f32 %v1183_v6  ;;  %1257 = vadd.xlane.f32.xlu2 %v1256_v30  ;;  %v3915_v54 = vpop.f32.mrf.mxu0  ;;  %v1091_v30 = vsel %vm1030_vm0, %v3895_v5, -inf }
 0x355   : > { %v1383_v14 = vadd.f32 %v2759_v20, %v1382_v4 }
 0x356   : > { %v2763_v9 = vpop.eup %2762 }
 0x357   : > { %v1395_v34 = vmul.f32 %v2763_v9, %v3869_v43  ;;  %v3889_v59 = vpop.xlane.xlu1 %1242  ;;  %v1072_v11 = vpop.xlane.xlu2 %1071  ;;  %v1387_v29 = vsel %vm1386_vm4, %v2759_v20, %v1383_v14  ;;  %vm1400_vm6 = vweird.f32 %v2763_v9  ;;  %v813_v20 = vadd.f32 %v3687_v17, %v3682_v12 }
 0x358   : > { %2766 = vrcp.f32 %v3889_v59  ;;  %v1140_v48 = vsub.f32 %v3771_v1, %v1072_v11  ;;  %v1392_v63 = vsel %vm1389_vm5, %v1391_v23, %v1387_v29  ;;  %vm1401_vm8 = vmor %vm1399_vm7, %vm1400_vm6  ;;  %v1420_v12 = vand.u32 2147483648, %v3889_v59  ;;  %v3922_v10 = vpop.f32.mrf.mxu1  ;;  %v2023_v23 = vld [vmem:[#allocation11 + $0x78] sm:$0xff] }
 0x359   : > { %v1396_v13 = vsub.f32 1.0, %v1395_v34  ;;  %v1393_v62 = vmul.f32 %v3755_v26, %v1392_v63  ;;  %v860_v51 = vmax.f32 %v813_v20, 0.0  ;;  %v1418_v7 = vand.u32 2147483647, %v3889_v59  ;;  %2153 = vmatpush.msrb.mxu2 %v2023_v23 }
 0x35a   : > { %v3900_v16 = vpop.eup %2764  ;;  %v1185_v28 = vmul.f32 1.442695, %v1140_v48  ;;  %2125 = vmatmul.f32.gmra.mxu0 %v859_v47  ;;  %vm1414_vm11 = vweird.f32 %v3889_v59  ;;  %v1421_v2 = vor.u32 1.1754944e-38, %v1420_v12  ;;  %v2018_v12 = vld [vmem:[#allocation11 + $0x50] sm:$0xff] }
 0x35b   : > { %v1397_v22 = vmul.f32 %v2763_v9, %v1396_v13  ;;  %2552 = vmatmul.msk.f32.gmra.mxu3 %vm1030_vm0, %v1393_v62  ;;  %v1259_v1 = vsel %vm1030_vm0, %v3900_v16, 0.0  ;;  %vm1419_vm13 = vcmp.eq.f32.partialorder %v1418_v7, 8.507059e+37 }
 0x35c   : > { %2768 = vpow2.f32 %v1185_v28  ;;  %1260 = vadd.xlane.f32.xlu1 %v1259_v1  ;;  %1089 = vmax.xlane.f32.xlu2 %v1088_v61  ;;  %v3939_v28 = vpop.f32.mrf.mxu0  ;;  %v2022_v1 = vld [vmem:[#allocation11 + $0x70] sm:$0xff] }
 0x35d   : > { %v1398_v21 = vadd.f32 %v2763_v9, %v1397_v22  ;;  %2154 = vmatpush.msrb.mxu2 %v2022_v1 }
 0x35e   : > { %v2767_v26 = vpop.eup %2766 }
 0x35f   : > { %v1410_v40 = vmul.f32 %v2767_v26, %v3889_v59  ;;  %v3911_v41 = vpop.xlane.xlu0 %1245  ;;  %v1075_v44 = vpop.xlane.xlu1 %1074  ;;  %v1402_v46 = vsel %vm1401_vm8, %v2763_v9, %v1398_v21  ;;  %vm1415_vm10 = vweird.f32 %v2767_v26  ;;  %v816_v9 = vadd.f32 %v3687_v17, %v3690_v37 }
 0x360   : > { %2770 = vrcp.f32 %v3911_v41  ;;  %v1141_v42 = vsub.f32 %v3781_v32, %v1075_v44  ;;  %v1407_v0 = vsel %vm1404_vm9, %v1406_v35, %v1402_v46  ;;  %vm1416_vm12 = vmor %vm1414_vm11, %vm1415_vm10  ;;  %v1435_v62 = vand.u32 2147483648, %v3911_v41  ;;  %v2021_v35 = vld [vmem:[#allocation11 + $0x68] sm:$0xff]  ;;  %v2020_v44 = vld [vmem:[#allocation11 + $0x60] sm:$0xff] }
 0x361   : > { %v1411_v43 = vsub.f32 1.0, %v1410_v40  ;;  %v1408_v50 = vmul.f32 %v3767_v49, %v1407_v0  ;;  %v861_v47 = vmax.f32 %v816_v9, 0.0  ;;  %v1433_v45 = vand.u32 2147483647, %v3911_v41  ;;  %2155 = vmatpush.msrb.mxu2 %v2021_v35  ;;  %v2019_v0 = vld [vmem:[#allocation11 + $0x58] sm:$0xff] }
 0x362   : > { %v3919_v57 = vpop.eup %2768  ;;  %v1187_v6 = vmul.f32 1.442695, %v1141_v42  ;;  %2128 = vmatmul.f32.gmra.mxu0 %v860_v51  ;;  %vm1429_vm15 = vweird.f32 %v3911_v41  ;;  %v819_v21 = vadd.f32 %v3687_v17, %v3694_v33  ;;  %v1436_v20 = vor.u32 1.1754944e-38, %v1435_v62  ;;  %v2009_v62 = vld [vmem:[#allocation11 + $0x8] sm:$0xff] }
 0x363   : > { %v1412_v4 = vmul.f32 %v2767_v26, %v1411_v43  ;;  %2553 = vmatmul.msk.f32.gmra.mxu3 %vm1030_vm0, %v1408_v50  ;;  %v1262_v32 = vsel %vm1030_vm0, %v3919_v57, 0.0  ;;  %vm1434_vm2 = vcmp.eq.f32.partialorder %v1433_v45, 8.507059e+37  ;;  %2156 = vmatpush.msrb.mxu2 %v2020_v44  ;;  %v828_v9 = vadd.f32 %v3687_v17, %v3715_v52 }
 0x364   : > { %2772 = vpow2.f32 %v1187_v6  ;;  %1263 = vadd.xlane.f32.xlu0 %v1262_v32  ;;  %1092 = vmax.xlane.f32.xlu1 %v1091_v30  ;;  %v862_v42 = vmax.f32 %v819_v21, 0.0  ;;  %v3961_v50 = vpop.f32.mrf.mxu0  ;;  %v2016_v6 = vld [vmem:[#allocation11 + $0x40] sm:$0xff]  ;;  %v834_v52 = vadd.f32 %v3687_v17, %v3737_v39 }
 0x365   : > { %v1413_v14 = vadd.f32 %v2767_v26, %v1412_v4  ;;  %2157 = vmatpush.msrb.mxu2 %v2019_v0  ;;  %v2017_v4 = vld [vmem:[#allocation11 + $0x48] sm:$0xff] }
 0x366   : > { %v2771_v49 = vpop.eup %2770 }
 0x367   : > { %v1425_v34 = vmul.f32 %v2771_v49, %v3911_v41  ;;  %v1078_v11 = vpop.xlane.xlu0 %1077  ;;  %v1417_v29 = vsel %vm1416_vm12, %v2767_v26, %v1413_v14  ;;  %vm1430_vm14 = vweird.f32 %v2771_v49  ;;  %v3949_v26 = vpop.f32.mrf.mxu1  ;;  %2158 = vmatpush.msrb.mxu2 %v2018_v12  ;;  %v825_v14 = vadd.f32 %v3687_v17, %v3705_v56 }
 0x368   : > { %v1142_v13 = vsub.f32 %v3790_v38, %v1078_v11  ;;  %v1422_v59 = vsel %vm1419_vm13, %v1421_v2, %v1417_v29  ;;  %vm1431_vm1 = vmor %vm1429_vm15, %vm1430_vm14  ;;  %v1097_v51 = vsel %vm1030_vm0, %v3949_v26, -inf  ;;  %v865_v2 = vmax.f32 %v828_v9, 0.0  ;;  %v2015_v11 = vld [vmem:[#allocation11 + $0x38] sm:$0xff] }
 0x369   : > { %v1426_v48 = vsub.f32 1.0, %v1425_v34  ;;  %v1423_v63 = vmul.f32 %v3777_v8, %v1422_v59  ;;  %v1094_v8 = vsel %vm1030_vm0, %v3922_v10, -inf  ;;  %2159 = vmatpush.msrb.mxu2 %v2017_v4  ;;  %v831_v34 = vadd.f32 %v3687_v17, %v3727_v58  ;;  %v2013_v59 = vld [vmem:[#allocation11 + $0x28] sm:$0xff]  ;;  %v2010_v58 = vld [vmem:[#allocation11 + $0x10] sm:$0xff] }
 0x36a   : > { %v1189_v37 = vmul.f32 1.442695, %v1142_v13  ;;  %v3936_v61 = vpop.eup %2772  ;;  %2131 = vmatmul.f32.gmra.mxu0 %v861_v47  ;;  %v2014_v13 = vld [vmem:[#allocation11 + $0x30] sm:$0xff]  ;;  %v867_v47 = vmax.f32 %v834_v52, 0.0 }
 0x36b   : > { %v1427_v22 = vmul.f32 %v2771_v49, %v1426_v48  ;;  %2554 = vmatmul.msk.f32.gmra.mxu3 %vm1030_vm0, %v1423_v63  ;;  %v1265_v38 = vsel %vm1030_vm0, %v3936_v61, 0.0  ;;  %2160 = vmatpush.msrb.mxu2 %v2016_v6  ;;  %v866_v29 = vmax.f32 %v831_v34, 0.0  ;;  %v2012_v48 = vld [vmem:[#allocation11 + $0x20] sm:$0xff]  ;;  %v2011_v63 = vld [vmem:[#allocation11 + $0x18] sm:$0xff] }
 0x36c   : > { %2774 = vpow2.f32 %v1189_v37  ;;  %1266 = vadd.xlane.f32.xlu2 %v1265_v38  ;;  %1095 = vmax.xlane.f32.xlu0 %v1094_v8 }
 0x36d   : > { %v1428_v18 = vadd.f32 %v2771_v49, %v1427_v22  ;;  %2161 = vmatpush.msrb.mxu2 %v2015_v11  ;;  %v2008_v22 = vld [vmem:[#allocation11] sm:$0xff] }
 0x36f   : > { %v1432_v40 = vsel %vm1431_vm1, %v2771_v49, %v1428_v18  ;;  %v3963_v7 = vpop.f32.mrf.mxu1  ;;  %v864_v49 = vmax.f32 %v825_v14, 0.0  ;;  %2162 = vmatpush.msrb.mxu2 %v2014_v13 }
 0x370   : > { %v1437_v46 = vsel %vm1434_vm2, %v1436_v20, %v1432_v40  ;;  %v1100_v30 = vsel %vm1030_vm0, %v3963_v7, -inf }
 0x371   : > { %v1438_v41 = vmul.f32 %v3786_v15, %v1437_v46  ;;  %v822_v15 = vadd.f32 %v3687_v17, %v3698_v31  ;;  %v3969_v31 = vpop.f32.mrf.mxu0  ;;  %2163 = vmatpush.msrb.mxu2 %v2013_v59 }
 0x372   : > { %v3952_v43 = vpop.eup %2774  ;;  %2134 = vmatmul.f32.gmra.mxu0 %v862_v42 }
 0x373   : > { %v1268_v33 = vsel %vm1030_vm0, %v3952_v43, 0.0  ;;  %2555 = vmatmul.msk.f32.gmra.mxu3 %vm1030_vm0, %v1438_v41  ;;  %v863_v32 = vmax.f32 %v822_v15, 0.0  ;;  %2164 = vmatpush.msrb.mxu2 %v2012_v48 }
 0x374   : > { %1269 = vadd.xlane.f32.xlu1 %v1268_v33  ;;  %1098 = vmax.xlane.f32.xlu2 %v1097_v51 }
 0x375   : > { %2165 = vmatpush.msrb.mxu2 %v2011_v63 }
 0x377   : > { %2166 = vmatpush.msrb.mxu2 %v2010_v58  ;;  %v3984_v1 = vpop.f32.mrf.mxu1 }
 0x379   : > { %v3973_v23 = vpop.f32.mrf.mxu0  ;;  %2167 = vmatpush.msrb.mxu2 %v2009_v62 }
 0x37a   : > { %2137 = vmatmul.f32.gmra.mxu0 %v863_v32 }
 0x37b   : > { %2168 = vmatpush.msrb.mxu2 %v2008_v22 }
 0x37c   : > { %1101 = vmax.xlane.f32.xlu1 %v1100_v30 }
 0x37f   : > { %v3990_v14 = vpop.f32.mrf.mxu1 }
 0x381   : > { %v3977_v56 = vpop.f32.mrf.mxu0 }
 0x382   : > { %2140 = vmatmul.f32.gmra.mxu0 %v864_v49 }
 0x389   : > { %v3981_v37 = vpop.f32.mrf.mxu0 }
 0x38a   : > { %2143 = vmatmul.f32.gmra.mxu0 %v865_v2 }
 0x392   : > { %2146 = vmatmul.f32.gmra.mxu0 %v866_v29 }
 0x39a   : > { %2149 = vmatmul.f32.gmra.mxu0 %v867_v47 }
 0x3af   : > { %v1249_v45 = vpop.xlane.xlu2 %1248 }
 0x3b0   : > { %2776 = vrcp.f32 %v1249_v45  ;;  %v1450_v40 = vand.u32 2147483648, %v1249_v45  ;;  %v1448_v44 = vand.u32 2147483647, %v1249_v45  ;;  %vm1444_vm4 = vweird.f32 %v1249_v45 }
 0x3b2   : > { %v1451_v0 = vor.u32 1.1754944e-38, %v1450_v40  ;;  %vm1449_vm6 = vcmp.eq.f32.partialorder %v1448_v44, 8.507059e+37 }
 0x3b6   : > { %v2777_v38 = vpop.eup %2776 }
 0x3b7   : > { %v1440_v8 = vmul.f32 %v2777_v38, %v1249_v45  ;;  %v1081_v17 = vpop.xlane.xlu2 %1080  ;;  %v1252_v39 = vpop.xlane.xlu1 %1251  ;;  %vm1445_vm3 = vweird.f32 %v2777_v38 }
 0x3b8   : > { %v1143_v18 = vsub.f32 %v3813_v55, %v1081_v17  ;;  %2778 = vrcp.f32 %v1252_v39  ;;  %vm1446_vm5 = vmor %vm1444_vm4, %vm1445_vm3  ;;  %v1465_v34 = vand.u32 2147483648, %v1252_v39  ;;  %v1463_v11 = vand.u32 2147483647, %v1252_v39 }
 0x3b9   : > { %v1441_v21 = vsub.f32 1.0, %v1440_v8  ;;  %vm1459_vm8 = vweird.f32 %v1252_v39 }
 0x3ba   : > { %v1191_v20 = vmul.f32 1.442695, %v1143_v18  ;;  %v1466_v52 = vor.u32 1.1754944e-38, %v1465_v34  ;;  %vm1464_vm10 = vcmp.eq.f32.partialorder %v1463_v11, 8.507059e+37 }
 0x3bb   : > { %v1442_v35 = vmul.f32 %v2777_v38, %v1441_v21  ;;  %v4006_v21 = vpop.f32.mrf.mxu1 }
 0x3bc   : > { %2780 = vpow2.f32 %v1191_v20 }
 0x3bd   : > { %v1443_v46 = vadd.f32 %v2777_v38, %v1442_v35 }
 0x3be   : > { %v1912_v41 = vpop.f32.mrf.mxu3  ;;  %v2779_v42 = vpop.eup %2778 }
 0x3bf   : > { %2169 = vmatmul.f32.vlgmr.msrb.gmra.mxu2 %v1912_v41  ;;  %v1255_v33 = vpop.xlane.xlu0 %1254  ;;  %v1447_v51 = vsel %vm1446_vm5, %v2777_v38, %v1443_v46  ;;  %v1455_v55 = vmul.f32 %v2779_v42, %v1252_v39  ;;  %v1084_v12 = vpop.xlane.xlu1 %1083  ;;  %vm1460_vm7 = vweird.f32 %v2779_v42  ;;  %v1103_v38 = vsel %vm1030_vm0, %v3984_v1, -inf }
 0x3c0   : > { %2782 = vrcp.f32 %v1255_v33  ;;  %v1144_v15 = vsub.f32 %v3826_v19, %v1084_v12  ;;  %v1452_v4 = vsel %vm1449_vm6, %v1451_v0, %v1447_v51  ;;  %vm1461_vm9 = vmor %vm1459_vm8, %vm1460_vm7  ;;  %v1480_v62 = vand.u32 2147483648, %v1255_v33 }
 0x3c1   : > { %v1456_v32 = vsub.f32 1.0, %v1455_v55  ;;  %v1453_v30 = vmul.f32 %v3820_v36, %v1452_v4  ;;  %v1478_v39 = vand.u32 2147483647, %v1255_v33  ;;  %vm1474_vm12 = vweird.f32 %v1255_v33 }
 0x3c2   : > { %v3987_v6 = vpop.eup %2780  ;;  %v1193_v49 = vmul.f32 1.442695, %v1144_v15  ;;  %v1481_v35 = vor.u32 1.1754944e-38, %v1480_v62  ;;  %v1106_v4 = vsel %vm1030_vm0, %v3990_v14, -inf }
 0x3c3   : > { %v1271_v9 = vsel %vm1030_vm0, %v3987_v6, 0.0  ;;  %v1457_v2 = vmul.f32 %v2779_v42, %v1456_v32  ;;  %2556 = vmatmul.msk.f32.gmra.mxu3 %vm1030_vm0, %v1453_v30  ;;  %vm1479_vm14 = vcmp.eq.f32.partialorder %v1478_v39, 8.507059e+37 }
 0x3c4   : > { %1272 = vadd.xlane.f32.xlu0 %v1271_v9  ;;  %2784 = vpow2.f32 %v1193_v49 }
 0x3c5   : > { %v1458_v29 = vadd.f32 %v2779_v42, %v1457_v2  ;;  %v4022_v2 = vpop.f32.mrf.mxu1 }
 0x3c6   : > { %v2783_v19 = vpop.eup %2782  ;;  %v1915_v36 = vpop.f32.mrf.mxu3 }
 0x3c7   : > { %v1470_v13 = vmul.f32 %v2783_v19, %v1255_v33  ;;  %v1087_v59 = vpop.xlane.xlu0 %1086  ;;  %2172 = vmatmul.f32.gmra.mxu2 %v1915_v36  ;;  %v3995_v48 = vpop.xlane.xlu2 %1257  ;;  %v1462_v47 = vsel %vm1461_vm9, %v2779_v42, %v1458_v29  ;;  %vm1475_vm11 = vweird.f32 %v2783_v19 }
 0x3c8   : > { %v1145_v63 = vsub.f32 %v3848_v24, %v1087_v59  ;;  %2786 = vrcp.f32 %v3995_v48  ;;  %v1467_v45 = vsel %vm1464_vm10, %v1466_v52, %v1462_v47  ;;  %vm1476_vm13 = vmor %vm1474_vm12, %vm1475_vm11  ;;  %v1495_v30 = vand.u32 2147483648, %v3995_v48 }
 0x3c9   : > { %v1471_v58 = vsub.f32 1.0, %v1470_v13  ;;  %v1468_v18 = vmul.f32 %v3838_v53, %v1467_v45  ;;  %v1493_v9 = vand.u32 2147483647, %v3995_v48  ;;  %vm1489_vm1 = vweird.f32 %v3995_v48 }
 0x3ca   : > { %v1195_v22 = vmul.f32 1.442695, %v1145_v63  ;;  %v4001_v8 = vpop.eup %2784  ;;  %v1496_v11 = vor.u32 1.1754944e-38, %v1495_v30  ;;  %v1109_v47 = vsel %vm1030_vm0, %v4006_v21, -inf }
 0x3cb   : > { %v1472_v17 = vmul.f32 %v2783_v19, %v1471_v58  ;;  %v1274_v24 = vsel %vm1030_vm0, %v4001_v8, 0.0  ;;  %2557 = vmatmul.msk.f32.gmra.mxu3 %vm1030_vm0, %v1468_v18  ;;  %vm1494_vm3 = vcmp.eq.f32.partialorder %v1493_v9, 8.507059e+37 }
 0x3cc   : > { %2788 = vpow2.f32 %v1195_v22  ;;  %1104 = vmax.xlane.f32.xlu0 %v1103_v38  ;;  %1275 = vadd.xlane.f32.xlu2 %v1274_v24 }
 0x3cd   : > { %v1473_v20 = vadd.f32 %v2783_v19, %v1472_v17 }
 0x3ce   : > { %v2787_v40 = vpop.eup %2786  ;;  %v1918_v44 = vpop.f32.mrf.mxu3 }
 0x3cf   : > { %v1477_v46 = vsel %vm1476_vm13, %v2783_v19, %v1473_v20  ;;  %v1485_v53 = vmul.f32 %v2787_v40, %v3995_v48  ;;  %2175 = vmatmul.f32.gmra.mxu2 %v1918_v44  ;;  %v1261_v41 = vpop.xlane.xlu1 %1260  ;;  %v1090_v42 = vpop.xlane.xlu2 %1089  ;;  %vm1490_vm15 = vweird.f32 %v2787_v40 }
 0x3d0   : > { %v1482_v0 = vsel %vm1479_vm14, %v1481_v35, %v1477_v46  ;;  %2790 = vrcp.f32 %v1261_v41  ;;  %v1146_v33 = vsub.f32 %v3871_v60, %v1090_v42  ;;  %vm1491_vm2 = vmor %vm1489_vm1, %vm1490_vm15  ;;  %v1510_v22 = vand.u32 2147483648, %v1261_v41  ;;  %v4033_v44 = vpop.f32.mrf.mxu1 }
 0x3d1   : > { %v1486_v55 = vsub.f32 1.0, %v1485_v53  ;;  %v1483_v12 = vmul.f32 %v3855_v25, %v1482_v0  ;;  %v1508_v38 = vand.u32 2147483647, %v1261_v41  ;;  %vm1504_vm5 = vweird.f32 %v1261_v41 }
 0x3d2   : > { %v4010_v51 = vpop.eup %2788  ;;  %v1197_v49 = vmul.f32 1.442695, %v1146_v33  ;;  %v1511_v18 = vor.u32 1.1754944e-38, %v1510_v22 }
 0x3d3   : > { %v1277_v15 = vsel %vm1030_vm0, %v4010_v51, 0.0  ;;  %v1487_v32 = vmul.f32 %v2787_v40, %v1486_v55  ;;  %2558 = vmatmul.msk.f32.gmra.mxu3 %vm1030_vm0, %v1483_v12  ;;  %vm1509_vm7 = vcmp.eq.f32.partialorder %v1508_v38, 8.507059e+37 }
 0x3d4   : > { %1278 = vadd.xlane.f32.xlu1 %v1277_v15  ;;  %1107 = vmax.xlane.f32.xlu2 %v1106_v4  ;;  %2792 = vpow2.f32 %v1197_v49 }
 0x3d5   : > { %v1488_v60 = vadd.f32 %v2787_v40, %v1487_v32  ;;  %v1112_v32 = vsel %vm1030_vm0, %v4022_v2, -inf }
 0x3d6   : > { %v2791_v25 = vpop.eup %2790  ;;  %v1921_v34 = vpop.f32.mrf.mxu3 }
 0x3d7   : > { %v1500_v19 = vmul.f32 %v2791_v25, %v1261_v41  ;;  %2178 = vmatmul.f32.gmra.mxu2 %v1921_v34  ;;  %v1264_v29 = vpop.xlane.xlu0 %1263  ;;  %v1093_v13 = vpop.xlane.xlu1 %1092  ;;  %v1492_v36 = vsel %vm1491_vm2, %v2787_v40, %v1488_v60  ;;  %vm1505_vm4 = vweird.f32 %v2791_v25 }
 0x3d8   : > { %2794 = vrcp.f32 %v1264_v29  ;;  %v1147_v52 = vsub.f32 %v3895_v5, %v1093_v13  ;;  %v1497_v63 = vsel %vm1494_vm3, %v1496_v11, %v1492_v36  ;;  %vm1506_vm6 = vmor %vm1504_vm5, %vm1505_vm4  ;;  %v1525_v33 = vand.u32 2147483648, %v1264_v29 }
 0x3d9   : > { %v1501_v59 = vsub.f32 1.0, %v1500_v19  ;;  %v1498_v48 = vmul.f32 %v3878_v3, %v1497_v63  ;;  %v1523_v15 = vand.u32 2147483647, %v1264_v29  ;;  %vm1519_vm9 = vweird.f32 %v1264_v29 }
 0x3da   : > { %v4028_v58 = vpop.eup %2792  ;;  %v1199_v45 = vmul.f32 1.442695, %v1147_v52  ;;  %v1526_v9 = vor.u32 1.1754944e-38, %v1525_v33 }
 0x3db   : > { %v1502_v62 = vmul.f32 %v2791_v25, %v1501_v59  ;;  %2559 = vmatmul.msk.f32.gmra.mxu3 %vm1030_vm0, %v1498_v48  ;;  %v1280_v17 = vsel %vm1030_vm0, %v4028_v58, 0.0  ;;  %vm1524_vm11 = vcmp.eq.f32.partialorder %v1523_v15, 8.507059e+37 }
 0x3dc   : > { %1110 = vmax.xlane.f32.xlu1 %v1109_v47  ;;  %2796 = vpow2.f32 %v1199_v45  ;;  %1281 = vadd.xlane.f32.xlu0 %v1280_v17 }
 0x3dd   : > { %v1503_v5 = vadd.f32 %v2791_v25, %v1502_v62  ;;  %v1115_v62 = vsel %vm1030_vm0, %v4033_v44, -inf }
 0x3de   : > { %v2795_v3 = vpop.eup %2794  ;;  %v1924_v39 = vpop.f32.mrf.mxu3 }
 0x3df   : > { %v1515_v24 = vmul.f32 %v2795_v3, %v1264_v29  ;;  %2181 = vmatmul.f32.gmra.mxu2 %v1924_v39  ;;  %v1267_v20 = vpop.xlane.xlu2 %1266  ;;  %v1096_v35 = vpop.xlane.xlu0 %1095  ;;  %v1507_v40 = vsel %vm1506_vm6, %v2791_v25, %v1503_v5  ;;  %vm1520_vm8 = vweird.f32 %v2795_v3 }
 0x3e0   : > { %2798 = vrcp.f32 %v1267_v20  ;;  %v1148_v53 = vsub.f32 %v3922_v10, %v1096_v35  ;;  %v1512_v42 = vsel %vm1509_vm7, %v1511_v18, %v1507_v40  ;;  %vm1521_vm10 = vmor %vm1519_vm9, %vm1520_vm8  ;;  %v1540_v36 = vand.u32 2147483648, %v1267_v20  ;;  %v4048_v29 = vpop.f32.mrf.mxu1 }
 0x3e1   : > { %v1516_v46 = vsub.f32 1.0, %v1515_v24  ;;  %v1513_v41 = vmul.f32 %v3900_v16, %v1512_v42  ;;  %v1538_v47 = vand.u32 2147483647, %v1267_v20  ;;  %vm1534_vm13 = vweird.f32 %v1267_v20 }
 0x3e2   : > { %v4037_v0 = vpop.eup %2796  ;;  %v1201_v12 = vmul.f32 1.442695, %v1148_v53 }
 0x3e3   : > { %v1517_v55 = vmul.f32 %v2795_v3, %v1516_v46  ;;  %2560 = vmatmul.msk.f32.gmra.mxu3 %vm1030_vm0, %v1513_v41  ;;  %v1283_v4 = vsel %vm1030_vm0, %v4037_v0, 0.0  ;;  %vm1539_vm15 = vcmp.eq.f32.partialorder %v1538_v47, 8.507059e+37 }
 0x3e4   : > { %2800 = vpow2.f32 %v1201_v12  ;;  %1284 = vadd.xlane.f32.xlu2 %v1283_v4  ;;  %1113 = vmax.xlane.f32.xlu0 %v1112_v32 }
 0x3e5   : > { %v1518_v30 = vadd.f32 %v2795_v3, %v1517_v55 }
 0x3e6   : > { %v2799_v16 = vpop.eup %2798  ;;  %v1927_v10 = vpop.f32.mrf.mxu3 }
 0x3e7   : > { %v1270_v49 = vpop.xlane.xlu1 %1269  ;;  %v1530_v60 = vmul.f32 %v2799_v16, %v1267_v20  ;;  %2184 = vmatmul.f32.gmra.mxu2 %v1927_v10  ;;  %v1099_v25 = vpop.xlane.xlu2 %1098  ;;  %v1522_v11 = vsel %vm1521_vm10, %v2795_v3, %v1518_v30  ;;  %vm1535_vm12 = vweird.f32 %v2799_v16 }
 0x3e8   : > { %2802 = vrcp.f32 %v1270_v49  ;;  %v1149_v34 = vsub.f32 %v3949_v26, %v1099_v25  ;;  %v1527_v13 = vsel %vm1524_vm11, %v1526_v9, %v1522_v11  ;;  %vm1536_vm14 = vmor %vm1534_vm13, %vm1535_vm12  ;;  %v1555_v35 = vand.u32 2147483648, %v1270_v49  ;;  %v4064_v33 = vpop.f32.mrf.mxu1 }
 0x3e9   : > { %v1531_v19 = vsub.f32 1.0, %v1530_v60  ;;  %v1528_v52 = vmul.f32 %v3919_v57, %v1527_v13  ;;  %v1541_v57 = vor.u32 1.1754944e-38, %v1540_v36  ;;  %v1553_v42 = vand.u32 2147483647, %v1270_v49  ;;  %v4082_v36 = vld [vmem:[%s4315_s8] ss:$0 sm:$0xff] }
 0x3ea   : > { %v1203_v59 = vmul.f32 1.442695, %v1149_v34  ;;  %v4046_v63 = vpop.eup %2800  ;;  %vm1549_vm2 = vweird.f32 %v1270_v49  ;;  %v1121_v10 = vsel %vm1030_vm0, %v4064_v33, -inf }
 0x3eb   : > { %v1532_v48 = vmul.f32 %v2799_v16, %v1531_v19  ;;  %2561 = vmatmul.msk.f32.gmra.mxu3 %vm1030_vm0, %v1528_v52  ;;  %v1286_v26 = vsel %vm1030_vm0, %v4046_v63, 0.0  ;;  %vm1554_vm4 = vcmp.eq.f32.partialorder %v1553_v42, 8.507059e+37 }
 0x3ec   : > { %2804 = vpow2.f32 %v1203_v59  ;;  %1287 = vadd.xlane.f32.xlu1 %v1286_v26  ;;  %1116 = vmax.xlane.f32.xlu2 %v1115_v62 }
 0x3ed   : > { %v1533_v45 = vadd.f32 %v2799_v16, %v1532_v48 }
 0x3ee   : > { %v2803_v22 = vpop.eup %2802  ;;  %v1930_v17 = vpop.f32.mrf.mxu3 }
 0x3ef   : > { %v1545_v38 = vmul.f32 %v2803_v22, %v1270_v49  ;;  %v1102_v5 = vpop.xlane.xlu1 %1101  ;;  %2187 = vmatmul.f32.gmra.mxu2 %v1930_v17  ;;  %v1537_v39 = vsel %vm1536_vm14, %v2799_v16, %v1533_v45  ;;  %vm1550_vm1 = vweird.f32 %v2803_v22 }
 0x3f0   : > { %v1150_v3 = vsub.f32 %v3963_v7, %v1102_v5  ;;  %v1542_v24 = vsel %vm1539_vm15, %v1541_v57, %v1537_v39  ;;  %v1118_v7 = vsel %vm1030_vm0, %v4048_v29, -inf  ;;  %vm1551_vm3 = vmor %vm1549_vm2, %vm1550_vm1  ;;  %v4074_v49 = vpop.f32.mrf.mxu1 }
 0x3f1   : > { %v1546_v18 = vsub.f32 1.0, %v1545_v38  ;;  %v1543_v46 = vmul.f32 %v3936_v61, %v1542_v24  ;;  %v1556_v61 = vor.u32 1.1754944e-38, %v1555_v35  ;;  %v1124_v9 = vsel %vm1030_vm0, %v4074_v49, -inf }
 0x3f2   : > { %v1205_v40 = vmul.f32 1.442695, %v1150_v3  ;;  %v4057_v53 = vpop.eup %2804 }
 0x3f3   : > { %v1547_v20 = vmul.f32 %v2803_v22, %v1546_v18  ;;  %v1289_v41 = vsel %vm1030_vm0, %v4057_v53, 0.0  ;;  %2562 = vmatmul.msk.f32.gmra.mxu3 %vm1030_vm0, %v1543_v46 }
 0x3f4   : > { %2806 = vpow2.f32 %v1205_v40  ;;  %1290 = vadd.xlane.f32.xlu0 %v1289_v41  ;;  %1119 = vmax.xlane.f32.xlu1 %v1118_v7 }
 0x3f5   : > { %v1548_v55 = vadd.f32 %v2803_v22, %v1547_v20 }
 0x3f6   : > { %v1933_v12 = vpop.f32.mrf.mxu3 }
 0x3f7   : > { %v1552_v15 = vsel %vm1551_vm3, %v2803_v22, %v1548_v55  ;;  %2190 = vmatmul.f32.gmra.mxu2 %v1933_v12 }
 0x3f8   : > { %v1557_v4 = vsel %vm1554_vm4, %v1556_v61, %v1552_v15 }
 0x3f9   : > { %v1558_v32 = vmul.f32 %v3952_v43, %v1557_v4 }
 0x3fa   : > { %v4067_v30 = vpop.eup %2806 }
 0x3fb   : > { %v1292_v16 = vsel %vm1030_vm0, %v4067_v30, 0.0  ;;  %2563 = vmatmul.msk.f32.gmra.mxu3 %vm1030_vm0, %v1558_v32 }
 0x3fc   : > { %1293 = vadd.xlane.f32.xlu2 %v1292_v16  ;;  %1122 = vmax.xlane.f32.xlu0 %v1121_v10 }
 0x404   : > { %1125 = vmax.xlane.f32.xlu2 %v1124_v9 }
 0x437   : > { %v1273_v60 = vpop.xlane.xlu0 %1272 }
 0x438   : > { %2808 = vrcp.f32 %v1273_v60  ;;  %v1570_v47 = vand.u32 2147483648, %v1273_v60  ;;  %v1568_v62 = vand.u32 2147483647, %v1273_v60  ;;  %vm1564_vm6 = vweird.f32 %v1273_v60 }
 0x43a   : > { %v1571_v38 = vor.u32 1.1754944e-38, %v1570_v47  ;;  %vm1569_vm8 = vcmp.eq.f32.partialorder %v1568_v62, 8.507059e+37 }
 0x43e   : > { %v2809_v43 = vpop.eup %2808 }
 0x43f   : > { %v1560_v25 = vmul.f32 %v2809_v43, %v1273_v60  ;;  %v1105_v34 = vpop.xlane.xlu0 %1104  ;;  %v1276_v11 = vpop.xlane.xlu2 %1275  ;;  %vm1565_vm5 = vweird.f32 %v2809_v43 }
 0x440   : > { %v1151_v19 = vsub.f32 %v3984_v1, %v1105_v34  ;;  %2810 = vrcp.f32 %v1276_v11  ;;  %vm4086_vm7 = vmor %vm1564_vm6, %vm1565_vm5  ;;  %v1585_v42 = vand.u32 2147483648, %v1276_v11  ;;  %v1583_v12 = vand.u32 2147483647, %v1276_v11 }
 0x441   : > { %v1561_v13 = vsub.f32 1.0, %v1560_v25  ;;  %vm1579_vm10 = vweird.f32 %v1276_v11 }
 0x442   : > { %v1207_v59 = vmul.f32 1.442695, %v1151_v19  ;;  %v2170_v52 = vpop.f32.mrf.mxu2  ;;  %v1586_v32 = vor.u32 1.1754944e-38, %v1585_v42  ;;  %vm1584_vm12 = vcmp.eq.f32.partialorder %v1583_v12, 8.507059e+37 }
 0x443   : > { %v1562_v48 = vmul.f32 %v2809_v43, %v1561_v13  ;;  %v2171_v26 = vadd.f32 %v2170_v52, %v3891_v27 }
 0x444   : > { %2812 = vpow2.f32 %v1207_v59 }
 0x445   : > { %v1563_v22 = vadd.f32 %v2809_v43, %v1562_v48  ;;  %v2270_v1 = vadd.f32 %v4082_v36, %v2171_v26 }
 0x446   : > { %v2811_v57 = vpop.eup %2810  ;;  %v1936_v5 = vpop.f32.mrf.mxu3 }
 0x447   : > { %v2302_v17 = vmax.f32 %v2270_v1, 0.0  ;;  %v1279_v3 = vpop.xlane.xlu1 %1278  ;;  %v1567_v39 = vsel %vm4086_vm7, %v2809_v43, %v1563_v22  ;;  %v1575_v27 = vmul.f32 %v2811_v57, %v1276_v11  ;;  %2193 = vmatmul.f32.gmra.mxu2 %v1936_v5  ;;  %v1108_v18 = vpop.xlane.xlu2 %1107  ;;  %vm1580_vm9 = vweird.f32 %v2811_v57 }
 0x448   : > { %2814 = vrcp.f32 %v1279_v3  ;;  %v1152_v24 = vsub.f32 %v3990_v14, %v1108_v18  ;;  %v1572_v35 = vsel %vm1569_vm8, %v1571_v38, %v1567_v39  ;;  %vm1581_vm11 = vmor %vm1579_vm10, %vm1580_vm9  ;;  %v1598_v13 = vand.u32 2147483647, %v1279_v3 }
 0x449   : > { %2334 = vst [vmem:[%s4094_s20] sm:$0xff] %v2302_v17  ;;  %v1576_v46 = vsub.f32 1.0, %v1575_v27  ;;  %v1573_v20 = vmul.f32 %v3987_v6, %v1572_v35  ;;  %v1600_v11 = vand.u32 2147483648, %v1279_v3  ;;  %vm1594_vm14 = vweird.f32 %v1279_v3 }
 0x44a   : > { %v4098_v40 = vpop.eup %2812  ;;  %v1209_v41 = vmul.f32 1.442695, %v1152_v24  ;;  %v2173_v55 = vpop.f32.mrf.mxu2  ;;  %vm1599_vm1 = vcmp.eq.f32.partialorder %v1598_v13, 8.507059e+37 }
 0x44b   : > { %v1295_v7 = vsel %vm1030_vm0, %v4098_v40, 0.0  ;;  %v1577_v61 = vmul.f32 %v2811_v57, %v1576_v46  ;;  %v2174_v15 = vadd.f32 %v2173_v55, %v3915_v54  ;;  %2564 = vmatmul.msk.f32.gmra.mxu3 %vm1030_vm0, %v1573_v20  ;;  %v1601_v1 = vor.u32 1.1754944e-38, %v1600_v11 }
 0x44c   : > { %1296 = vadd.xlane.f32.xlu1 %v1295_v7  ;;  %2816 = vpow2.f32 %v1209_v41 }
 0x44d   : > { %v1578_v4 = vadd.f32 %v2811_v57, %v1577_v61  ;;  %v2271_v6 = vadd.f32 %v4082_v36, %v2174_v15 }
 0x44e   : > { %v2815_v14 = vpop.eup %2814  ;;  %v1939_v60 = vpop.f32.mrf.mxu3 }
 0x44f   : > { %v1590_v16 = vmul.f32 %v2815_v14, %v1279_v3  ;;  %v1111_v10 = vpop.xlane.xlu1 %1110  ;;  %v2303_v9 = vmax.f32 %v2271_v6, 0.0  ;;  %v1582_v54 = vsel %vm1581_vm11, %v2811_v57, %v1578_v4  ;;  %2196 = vmatmul.f32.gmra.mxu2 %v1939_v60  ;;  %v4107_v34 = vpop.xlane.xlu0 %1281  ;;  %vm1595_vm13 = vweird.f32 %v2815_v14 }
 0x450   : > { %v1153_v43 = vsub.f32 %v4006_v21, %v1111_v10  ;;  %v1587_v19 = vsel %vm1584_vm12, %v1586_v32, %v1582_v54  ;;  %2818 = vrcp.f32 %v4107_v34  ;;  %vm1596_vm15 = vmor %vm1594_vm14, %vm1595_vm13  ;;  %v1615_v55 = vand.u32 2147483648, %v4107_v34 }
 0x451   : > { %v1591_v25 = vsub.f32 1.0, %v1590_v16  ;;  %2335 = vst [vmem:[%s4094_s20 + $0x8] sm:$0xff] %v2303_v9  ;;  %v1588_v26 = vmul.f32 %v4001_v8, %v1587_v19  ;;  %vm1609_vm3 = vweird.f32 %v4107_v34 }
 0x452   : > { %v4111_v59 = vpop.eup %2816  ;;  %v1211_v48 = vmul.f32 1.442695, %v1153_v43  ;;  %v2176_v47 = vpop.f32.mrf.mxu2  ;;  %v1616_v4 = vor.u32 1.1754944e-38, %v1615_v55 }
 0x453   : > { %v1592_v52 = vmul.f32 %v2815_v14, %v1591_v25  ;;  %v2177_v21 = vadd.f32 %v2176_v47, %v3939_v28  ;;  %v1298_v62 = vsel %vm1030_vm0, %v4111_v59, 0.0  ;;  %2565 = vmatmul.msk.f32.gmra.mxu3 %vm1030_vm0, %v1588_v26 }
 0x454   : > { %2820 = vpow2.f32 %v1211_v48  ;;  %1299 = vadd.xlane.f32.xlu0 %v1298_v62 }
 0x455   : > { %v1593_v22 = vadd.f32 %v2815_v14, %v1592_v52  ;;  %v2272_v45 = vadd.f32 %v4082_v36, %v2177_v21 }
 0x456   : > { %v2819_v38 = vpop.eup %2818  ;;  %v1942_v17 = vpop.f32.mrf.mxu3 }
 0x457   : > { %v1597_v57 = vsel %vm1596_vm15, %v2815_v14, %v1593_v22  ;;  %v2304_v8 = vmax.f32 %v2272_v45, 0.0  ;;  %v1605_v5 = vmul.f32 %v2819_v38, %v4107_v34  ;;  %2199 = vmatmul.f32.gmra.mxu2 %v1942_v17  ;;  %v4120_v39 = vpop.xlane.xlu2 %1284  ;;  %v1114_v3 = vpop.xlane.xlu0 %1113  ;;  %vm1610_vm2 = vweird.f32 %v2819_v38 }
 0x458   : > { %v1602_v28 = vsel %vm1599_vm1, %v1601_v1, %v1597_v57  ;;  %2822 = vrcp.f32 %v4120_v39  ;;  %v1154_v35 = vsub.f32 %v4022_v2, %v1114_v3  ;;  %vm4136_vm4 = vmor %vm1609_vm3, %vm1610_vm2  ;;  %v1630_v11 = vand.u32 2147483648, %v4120_v39 }
 0x459   : > { %v1603_v27 = vmul.f32 %v4010_v51, %v1602_v28  ;;  %2336 = vst [vmem:[%s4094_s20 + $0x10] sm:$0xff] %v2304_v8  ;;  %v1606_v24 = vsub.f32 1.0, %v1605_v5  ;;  %v1613_v51 = vand.u32 2147483647, %v4107_v34  ;;  %v1628_v48 = vand.u32 2147483647, %v4120_v39 }
 0x45a   : > { %v4125_v18 = vpop.eup %2820  ;;  %v2179_v46 = vpop.f32.mrf.mxu2  ;;  %v1213_v7 = vmul.f32 1.442695, %v1154_v35  ;;  %vm1624_vm7 = vweird.f32 %v4120_v39  ;;  %v1631_v22 = vor.u32 1.1754944e-38, %v1630_v11 }
 0x45b   : > { %v2180_v20 = vadd.f32 %v2179_v46, %v3961_v50  ;;  %v1301_v42 = vsel %vm1030_vm0, %v4125_v18, 0.0  ;;  %v1607_v41 = vmul.f32 %v2819_v38, %v1606_v24  ;;  %2566 = vmatmul.msk.f32.gmra.mxu3 %vm1030_vm0, %v1603_v27  ;;  %vm1614_vm5 = vcmp.eq.f32.partialorder %v1613_v51, 8.507059e+37 }
 0x45c   : > { %1302 = vadd.xlane.f32.xlu1 %v1301_v42  ;;  %2824 = vpow2.f32 %v1213_v7  ;;  %vm1629_vm9 = vcmp.eq.f32.partialorder %v1628_v48, 8.507059e+37 }
 0x45d   : > { %v2273_v61 = vadd.f32 %v4082_v36, %v2180_v20  ;;  %v1608_v2 = vadd.f32 %v2819_v38, %v1607_v41 }
 0x45e   : > { %v2823_v50 = vpop.eup %2822  ;;  %v1945_v14 = vpop.f32.mrf.mxu3 }
 0x45f   : > { %v2305_v15 = vmax.f32 %v2273_v61, 0.0  ;;  %v1620_v6 = vmul.f32 %v2823_v50, %v4120_v39  ;;  %2202 = vmatmul.f32.gmra.mxu2 %v1945_v14  ;;  %v4141_v32 = vpop.xlane.xlu1 %1287  ;;  %v1117_v16 = vpop.xlane.xlu2 %1116  ;;  %v1612_v10 = vsel %vm4136_vm4, %v2819_v38, %v1608_v2  ;;  %vm1625_vm6 = vweird.f32 %v2823_v50 }
 0x460   : > { %2826 = vrcp.f32 %v4141_v32  ;;  %v1155_v60 = vsub.f32 %v4033_v44, %v1117_v16  ;;  %v1617_v54 = vsel %vm1614_vm5, %v1616_v4, %v1612_v10  ;;  %vm1626_vm8 = vmor %vm1624_vm7, %vm1625_vm6  ;;  %v1643_v24 = vand.u32 2147483647, %v4141_v32 }
 0x461   : > { %2337 = vst [vmem:[%s4094_s20 + $0x18] sm:$0xff] %v2305_v15  ;;  %v1621_v9 = vsub.f32 1.0, %v1620_v6  ;;  %v1618_v34 = vmul.f32 %v4028_v58, %v1617_v54  ;;  %v1645_v35 = vand.u32 2147483648, %v4141_v32  ;;  %vm1639_vm11 = vweird.f32 %v4141_v32 }
 0x462   : > { %v2182_v43 = vpop.f32.mrf.mxu2  ;;  %v4150_v19 = vpop.eup %2824  ;;  %v1215_v52 = vmul.f32 1.442695, %v1155_v60  ;;  %vm1644_vm13 = vcmp.eq.f32.partialorder %v1643_v24, 8.507059e+37 }
 0x463   : > { %v2183_v25 = vadd.f32 %v2182_v43, %v3969_v31  ;;  %v1622_v13 = vmul.f32 %v2823_v50, %v1621_v9  ;;  %2567 = vmatmul.msk.f32.gmra.mxu3 %vm1030_vm0, %v1618_v34  ;;  %v1304_v44 = vsel %vm1030_vm0, %v4150_v19, 0.0  ;;  %v1646_v61 = vor.u32 1.1754944e-38, %v1645_v35  ;;  %v2081_v24 = vpop.f32.mrf.mxu0 }
 0x464   : > { %2828 = vpow2.f32 %v1215_v52  ;;  %1305 = vadd.xlane.f32.xlu2 %v1304_v44 }
 0x465   : > { %v2274_v47 = vadd.f32 %v4082_v36, %v2183_v25  ;;  %v1623_v31 = vadd.f32 %v2823_v50, %v1622_v13 }
 0x466   : > { %v2827_v58 = vpop.eup %2826  ;;  %v1948_v21 = vpop.f32.mrf.mxu3 }
 0x467   : > { %v2306_v26 = vmax.f32 %v2274_v47, 0.0  ;;  %v4159_v62 = vpop.xlane.xlu0 %1290  ;;  %v1635_v1 = vmul.f32 %v2827_v58, %v4141_v32  ;;  %2205 = vmatmul.f32.gmra.mxu2 %v1948_v21  ;;  %v1120_v45 = vpop.xlane.xlu1 %1119  ;;  %v1627_v38 = vsel %vm1626_vm8, %v2823_v50, %v1623_v31  ;;  %vm1640_vm10 = vweird.f32 %v2827_v58 }
 0x468   : > { %2830 = vrcp.f32 %v4159_v62  ;;  %v1156_v57 = vsub.f32 %v4048_v29, %v1120_v45  ;;  %v1632_v28 = vsel %vm1629_vm9, %v1631_v22, %v1627_v38  ;;  %vm1641_vm12 = vmor %vm1639_vm11, %vm1640_vm10  ;;  %v1658_v15 = vand.u32 2147483647, %v4159_v62 }
 0x469   : > { %2338 = vst [vmem:[%s4094_s20 + $0x20] sm:$0xff] %v2306_v26  ;;  %v1636_v8 = vsub.f32 1.0, %v1635_v1  ;;  %v1633_v46 = vmul.f32 %v4037_v0, %v1632_v28  ;;  %v1660_v14 = vand.u32 2147483648, %v4159_v62  ;;  %vm1654_vm15 = vweird.f32 %v4159_v62 }
 0x46a   : > { %v2185_v17 = vpop.f32.mrf.mxu2  ;;  %v1217_v5 = vmul.f32 1.442695, %v1156_v57  ;;  %v4166_v3 = vpop.eup %2828  ;;  %vm1659_vm2 = vcmp.eq.f32.partialorder %v1658_v15, 8.507059e+37 }
 0x46b   : > { %v2186_v39 = vadd.f32 %v2185_v17, %v3973_v23  ;;  %v1637_v27 = vmul.f32 %v2827_v58, %v1636_v8  ;;  %v1307_v20 = vsel %vm1030_vm0, %v4166_v3, 0.0  ;;  %2568 = vmatmul.msk.f32.gmra.mxu3 %vm1030_vm0, %v1633_v46  ;;  %v1661_v34 = vor.u32 1.1754944e-38, %v1660_v14 }
 0x46c   : > { %2832 = vpow2.f32 %v1217_v5  ;;  %1308 = vadd.xlane.f32.xlu0 %v1307_v20  ;;  %v2084_v20 = vpop.f32.mrf.mxu0 }
 0x46d   : > { %v2275_v29 = vadd.f32 %v4082_v36, %v2186_v39  ;;  %v1638_v41 = vadd.f32 %v2827_v58, %v1637_v27 }
 0x46e   : > { %v2831_v42 = vpop.eup %2830  ;;  %v1951_v7 = vpop.f32.mrf.mxu3 }
 0x46f   : > { %v4175_v23 = vpop.xlane.xlu2 %1293  ;;  %v1650_v55 = vmul.f32 %v2831_v42, %v4159_v62  ;;  %v2307_v0 = vmax.f32 %v2275_v29, 0.0  ;;  %v1123_v51 = vpop.xlane.xlu0 %1122  ;;  %2208 = vmatmul.f32.gmra.mxu2 %v1951_v7  ;;  %v1642_v12 = vsel %vm1641_vm12, %v2827_v58, %v1638_v41  ;;  %vm1655_vm14 = vweird.f32 %v2831_v42 }
 0x470   : > { %2834 = vrcp.f32 %v4175_v23  ;;  %v1157_v2 = vsub.f32 %v4064_v33, %v1123_v51  ;;  %v1647_v32 = vsel %vm1644_vm13, %v1646_v61, %v1642_v12  ;;  %vm1656_vm1 = vmor %vm1654_vm15, %vm1655_vm14  ;;  %v1675_v31 = vand.u32 2147483648, %v4175_v23 }
 0x471   : > { %v1651_v50 = vsub.f32 1.0, %v1650_v55  ;;  %2339 = vst [vmem:[%s4094_s20 + $0x28] sm:$0xff] %v2307_v0  ;;  %v1648_v60 = vmul.f32 %v4046_v63, %v1647_v32  ;;  %v1673_v62 = vand.u32 2147483647, %v4175_v23  ;;  %vm1669_vm4 = vweird.f32 %v4175_v23 }
 0x472   : > { %v1219_v4 = vmul.f32 1.442695, %v1157_v2  ;;  %v2188_v6 = vpop.f32.mrf.mxu2  ;;  %v4185_v16 = vpop.eup %2832  ;;  %v1676_v38 = vor.u32 1.1754944e-38, %v1675_v31 }
 0x473   : > { %v1652_v10 = vmul.f32 %v2831_v42, %v1651_v50  ;;  %v2189_v9 = vadd.f32 %v2188_v6, %v3977_v56  ;;  %v1310_v33 = vsel %vm1030_vm0, %v4185_v16, 0.0  ;;  %2569 = vmatmul.msk.f32.gmra.mxu3 %vm1030_vm0, %v1648_v60  ;;  %vm1674_vm6 = vcmp.eq.f32.partialorder %v1673_v62, 8.507059e+37 }
 0x474   : > { %2836 = vpow2.f32 %v1219_v4  ;;  %1311 = vadd.xlane.f32.xlu1 %v1310_v33 }
 0x475   : > { %v1653_v54 = vadd.f32 %v2831_v42, %v1652_v10  ;;  %v2276_v25 = vadd.f32 %v4082_v36, %v2189_v9  ;;  %v2087_v10 = vpop.f32.mrf.mxu0 }
 0x476   : > { %v2835_v43 = vpop.eup %2834  ;;  %v1954_v11 = vpop.f32.mrf.mxu3 }
 0x477   : > { %v1665_v13 = vmul.f32 %v2835_v43, %v4175_v23  ;;  %v1126_v56 = vpop.xlane.xlu2 %1125  ;;  %v2308_v63 = vmax.f32 %v2276_v25, 0.0  ;;  %v1657_v48 = vsel %vm1656_vm1, %v2831_v42, %v1653_v54  ;;  %2211 = vmatmul.f32.gmra.mxu2 %v1954_v11  ;;  %vm1670_vm3 = vweird.f32 %v2835_v43 }
 0x478   : > { %v1158_v52 = vsub.f32 %v4074_v49, %v1126_v56  ;;  %v1662_v44 = vsel %vm1659_vm2, %v1661_v34, %v1657_v48  ;;  %vm1671_vm5 = vmor %vm1669_vm4, %vm1670_vm3 }
 0x479   : > { %v1666_v47 = vsub.f32 1.0, %v1665_v13  ;;  %2340 = vst [vmem:[%s4094_s20 + $0x30] sm:$0xff] %v2308_v63  ;;  %v1663_v1 = vmul.f32 %v4057_v53, %v1662_v44 }
 0x47a   : > { %v1221_v58 = vmul.f32 1.442695, %v1158_v52  ;;  %v4198_v26 = vpop.eup %2836  ;;  %v2191_v22 = vpop.f32.mrf.mxu2 }
 0x47b   : > { %v1667_v21 = vmul.f32 %v2835_v43, %v1666_v47  ;;  %v2192_v49 = vadd.f32 %v2191_v22, %v3981_v37  ;;  %v1313_v45 = vsel %vm1030_vm0, %v4198_v26, 0.0  ;;  %2570 = vmatmul.msk.f32.gmra.mxu3 %vm1030_vm0, %v1663_v1 }
 0x47c   : > { %2838 = vpow2.f32 %v1221_v58  ;;  %1314 = vadd.xlane.f32.xlu2 %v1313_v45 }
 0x47d   : > { %v1668_v57 = vadd.f32 %v2835_v43, %v1667_v21  ;;  %v2277_v8 = vadd.f32 %v4082_v36, %v2192_v49  ;;  %v2090_v22 = vpop.f32.mrf.mxu0 }
 0x47e   : > { %v1957_v28 = vpop.f32.mrf.mxu3 }
 0x47f   : > { %v1672_v17 = vsel %vm1671_vm5, %v2835_v43, %v1668_v57  ;;  %v2309_v53 = vmax.f32 %v2277_v8, 0.0  ;;  %2214 = vmatmul.f32.gmra.mxu2 %v1957_v28 }
 0x480   : > { %v1677_v5 = vsel %vm1674_vm6, %v1676_v38, %v1672_v17 }
 0x481   : > { %2341 = vst [vmem:[%s4094_s20 + $0x38] sm:$0xff] %v2309_v53  ;;  %v1678_v39 = vmul.f32 %v4067_v30, %v1677_v5 }
 0x482   : > { %v4208_v37 = vpop.eup %2838 }
 0x483   : > { %v1316_v27 = vsel %vm1030_vm0, %v4208_v37, 0.0  ;;  %2571 = vmatmul.msk.f32.gmra.mxu3 %vm1030_vm0, %v1678_v39 }
 0x484   : > { %1317 = vadd.xlane.f32.xlu0 %v1316_v27 }
 0x4bf   : > { %v1297_v35 = vpop.xlane.xlu1 %1296 }
 0x4c0   : > { %2840 = vrcp.f32 %v1297_v35  ;;  %v1690_v23 = vand.u32 2147483648, %v1297_v35  ;;  %v1688_v0 = vand.u32 2147483647, %v1297_v35  ;;  %vm1684_vm8 = vweird.f32 %v1297_v35 }
 0x4c2   : > { %v1691_v61 = vor.u32 1.1754944e-38, %v1690_v23  ;;  %vm1689_vm10 = vcmp.eq.f32.partialorder %v1688_v0, 8.507059e+37 }
 0x4c6   : > { %v2841_v46 = vpop.eup %2840 }
 0x4c7   : > { %v1680_v29 = vmul.f32 %v2841_v46, %v1297_v35  ;;  %v1300_v42 = vpop.xlane.xlu0 %1299  ;;  %vm1685_vm7 = vweird.f32 %v2841_v46 }
 0x4c8   : > { %2842 = vrcp.f32 %v1300_v42  ;;  %vm1686_vm9 = vmor %vm1684_vm8, %vm1685_vm7  ;;  %v1705_v33 = vand.u32 2147483648, %v1300_v42  ;;  %v1703_v54 = vand.u32 2147483647, %v1300_v42  ;;  %vm1699_vm12 = vweird.f32 %v1300_v42 }
 0x4c9   : > { %v1681_v41 = vsub.f32 1.0, %v1680_v29 }
 0x4ca   : > { %v2194_v30 = vpop.f32.mrf.mxu2  ;;  %v1706_v63 = vor.u32 1.1754944e-38, %v1705_v33  ;;  %vm1704_vm14 = vcmp.eq.f32.partialorder %v1703_v54, 8.507059e+37 }
 0x4cb   : > { %v1682_v55 = vmul.f32 %v2841_v46, %v1681_v41  ;;  %v2195_v7 = vadd.f32 %v2194_v30, %v2081_v24 }
 0x4cd   : > { %v1683_v51 = vadd.f32 %v2841_v46, %v1682_v55  ;;  %v2278_v2 = vadd.f32 %v4082_v36, %v2195_v7 }
 0x4ce   : > { %v2843_v50 = vpop.eup %2842  ;;  %v1960_v12 = vpop.f32.mrf.mxu3 }
 0x4cf   : > { %v1687_v15 = vsel %vm1686_vm9, %v2841_v46, %v1683_v51  ;;  %v1695_v14 = vmul.f32 %v2843_v50, %v1300_v42  ;;  %v2310_v4 = vmax.f32 %v2278_v2, 0.0  ;;  %2217 = vmatmul.f32.gmra.mxu2 %v1960_v12  ;;  %v1303_v6 = vpop.xlane.xlu1 %1302  ;;  %vm1700_vm11 = vweird.f32 %v2843_v50  ;;  %v2093_v42 = vpop.f32.mrf.mxu0 }
 0x4d0   : > { %v1692_v32 = vsel %vm1689_vm10, %v1691_v61, %v1687_v15  ;;  %2844 = vrcp.f32 %v1303_v6  ;;  %vm1701_vm13 = vmor %vm1699_vm12, %vm1700_vm11  ;;  %v1720_v62 = vand.u32 2147483648, %v1303_v6  ;;  %v1718_v49 = vand.u32 2147483647, %v1303_v6 }
 0x4d1   : > { %v1696_v9 = vsub.f32 1.0, %v1695_v14  ;;  %2342 = vst [vmem:[%s4094_s20 + $0x40] sm:$0xff] %v2310_v4  ;;  %v1693_v60 = vmul.f32 %v4098_v40, %v1692_v32  ;;  %vm1714_vm1 = vweird.f32 %v1303_v6 }
 0x4d2   : > { %v2197_v25 = vpop.f32.mrf.mxu2  ;;  %v1721_v8 = vor.u32 1.1754944e-38, %v1720_v62  ;;  %vm1719_vm3 = vcmp.eq.f32.partialorder %v1718_v49, 8.507059e+37 }
 0x4d3   : > { %v1697_v43 = vmul.f32 %v2843_v50, %v1696_v9  ;;  %2572 = vmatmul.msk.f32.gmra.mxu3 %vm1030_vm0, %v1693_v60  ;;  %v2198_v34 = vadd.f32 %v2197_v25, %v2084_v20 }
 0x4d5   : > { %v1698_v13 = vadd.f32 %v2843_v50, %v1697_v43  ;;  %v2279_v11 = vadd.f32 %v4082_v36, %v2198_v34 }
 0x4d6   : > { %v2845_v56 = vpop.eup %2844  ;;  %v1963_v48 = vpop.f32.mrf.mxu3 }
 0x4d7   : > { %v1710_v52 = vmul.f32 %v2845_v56, %v1303_v6  ;;  %v1702_v40 = vsel %vm1701_vm13, %v2843_v50, %v1698_v13  ;;  %v2311_v47 = vmax.f32 %v2279_v11, 0.0  ;;  %2220 = vmatmul.f32.gmra.mxu2 %v1963_v48  ;;  %v1306_v58 = vpop.xlane.xlu2 %1305  ;;  %vm1715_vm15 = vweird.f32 %v2845_v56  ;;  %v2096_v54 = vpop.f32.mrf.mxu0 }
 0x4d8   : > { %v1707_v44 = vsel %vm1704_vm14, %v1706_v63, %v1702_v40  ;;  %2846 = vrcp.f32 %v1306_v58  ;;  %vm1716_vm2 = vmor %vm1714_vm1, %vm1715_vm15  ;;  %v1735_v23 = vand.u32 2147483648, %v1306_v58  ;;  %v1733_v55 = vand.u32 2147483647, %v1306_v58 }
 0x4d9   : > { %v1711_v31 = vsub.f32 1.0, %v1710_v52  ;;  %v1708_v21 = vmul.f32 %v4111_v59, %v1707_v44  ;;  %2343 = vst [vmem:[%s4094_s20 + $0x48] sm:$0xff] %v2311_v47  ;;  %vm1729_vm5 = vweird.f32 %v1306_v58 }
 0x4da   : > { %v2200_v45 = vpop.f32.mrf.mxu2  ;;  %v1736_v2 = vor.u32 1.1754944e-38, %v1735_v23  ;;  %vm1734_vm7 = vcmp.eq.f32.partialorder %v1733_v55, 8.507059e+37 }
 0x4db   : > { %v1712_v1 = vmul.f32 %v2845_v56, %v1711_v31  ;;  %2573 = vmatmul.msk.f32.gmra.mxu3 %vm1030_vm0, %v1708_v21  ;;  %v2201_v57 = vadd.f32 %v2200_v45, %v2087_v10 }
 0x4dd   : > { %v1713_v38 = vadd.f32 %v2845_v56, %v1712_v1  ;;  %v2280_v17 = vadd.f32 %v4082_v36, %v2201_v57 }
 0x4de   : > { %v1966_v59 = vpop.f32.mrf.mxu3  ;;  %v2847_v28 = vpop.eup %2846 }
 0x4df   : > { %v1717_v53 = vsel %vm1716_vm2, %v2845_v56, %v1713_v38  ;;  %v2312_v5 = vmax.f32 %v2280_v17, 0.0  ;;  %2223 = vmatmul.f32.gmra.mxu2 %v1966_v59  ;;  %v1725_v27 = vmul.f32 %v2847_v28, %v1306_v58  ;;  %v1309_v24 = vpop.xlane.xlu0 %1308  ;;  %vm1730_vm4 = vweird.f32 %v2847_v28 }
 0x4e0   : > { %v1722_v39 = vsel %vm1719_vm3, %v1721_v8, %v1717_v53  ;;  %2848 = vrcp.f32 %v1309_v24  ;;  %vm1731_vm6 = vmor %vm1729_vm5, %vm1730_vm4  ;;  %v1750_v6 = vand.u32 2147483648, %v1309_v24  ;;  %v1748_v60 = vand.u32 2147483647, %v1309_v24  ;;  %v2099_v8 = vpop.f32.mrf.mxu0 }
 0x4e1   : > { %v1723_v35 = vmul.f32 %v4125_v18, %v1722_v39  ;;  %2344 = vst [vmem:[%s4094_s20 + $0x50] sm:$0xff] %v2312_v5  ;;  %v1726_v46 = vsub.f32 1.0, %v1725_v27  ;;  %vm1744_vm9 = vweird.f32 %v1309_v24 }
 0x4e2   : > { %v2203_v29 = vpop.f32.mrf.mxu2  ;;  %v1751_v13 = vor.u32 1.1754944e-38, %v1750_v6  ;;  %vm1749_vm11 = vcmp.eq.f32.partialorder %v1748_v60, 8.507059e+37 }
 0x4e3   : > { %2574 = vmatmul.msk.f32.gmra.mxu3 %vm1030_vm0, %v1723_v35  ;;  %v2204_v20 = vadd.f32 %v2203_v29, %v2090_v22  ;;  %v1727_v41 = vmul.f32 %v2847_v28, %v1726_v46 }
 0x4e5   : > { %v2281_v0 = vadd.f32 %v4082_v36, %v2204_v20  ;;  %v1728_v30 = vadd.f32 %v2847_v28, %v1727_v41 }
 0x4e6   : > { %v2849_v7 = vpop.eup %2848  ;;  %v1969_v18 = vpop.f32.mrf.mxu3 }
 0x4e7   : > { %v2313_v51 = vmax.f32 %v2281_v0, 0.0  ;;  %v1312_v61 = vpop.xlane.xlu1 %1311  ;;  %v1740_v50 = vmul.f32 %v2849_v7, %v1309_v24  ;;  %2226 = vmatmul.f32.gmra.mxu2 %v1969_v18  ;;  %v1732_v12 = vsel %vm1731_vm6, %v2847_v28, %v1728_v30  ;;  %vm1745_vm8 = vweird.f32 %v2849_v7 }
 0x4e8   : > { %2850 = vrcp.f32 %v1312_v61  ;;  %v1737_v4 = vsel %vm1734_vm7, %v1736_v2, %v1732_v12  ;;  %vm1746_vm10 = vmor %vm1744_vm9, %vm1745_vm8  ;;  %v1765_v40 = vand.u32 2147483648, %v1312_v61  ;;  %v1763_v58 = vand.u32 2147483647, %v1312_v61  ;;  %v2102_v2 = vpop.f32.mrf.mxu0 }
 0x4e9   : > { %2345 = vst [vmem:[%s4094_s20 + $0x58] sm:$0xff] %v2313_v51  ;;  %v1741_v15 = vsub.f32 1.0, %v1740_v50  ;;  %v1738_v10 = vmul.f32 %v4150_v19, %v1737_v4  ;;  %vm1759_vm13 = vweird.f32 %v1312_v61 }
 0x4ea   : > { %v2206_v14 = vpop.f32.mrf.mxu2  ;;  %v1766_v45 = vor.u32 1.1754944e-38, %v1765_v40  ;;  %vm1764_vm15 = vcmp.eq.f32.partialorder %v1763_v58, 8.507059e+37 }
 0x4eb   : > { %v2207_v32 = vadd.f32 %v2206_v14, %v2093_v42  ;;  %v1742_v9 = vmul.f32 %v2849_v7, %v1741_v15  ;;  %2575 = vmatmul.msk.f32.gmra.mxu3 %vm1030_vm0, %v1738_v10 }
 0x4ed   : > { %v2282_v33 = vadd.f32 %v4082_v36, %v2207_v32  ;;  %v1743_v25 = vadd.f32 %v2849_v7, %v1742_v9 }
 0x4ee   : > { %v2851_v43 = vpop.eup %2850  ;;  %v1972_v19 = vpop.f32.mrf.mxu3 }
 0x4ef   : > { %v1315_v34 = vpop.xlane.xlu2 %1314  ;;  %v1755_v56 = vmul.f32 %v2851_v43, %v1312_v61  ;;  %v2314_v63 = vmax.f32 %v2282_v33, 0.0  ;;  %v1747_v11 = vsel %vm1746_vm10, %v2849_v7, %v1743_v25  ;;  %2229 = vmatmul.f32.gmra.mxu2 %v1972_v19  ;;  %vm1760_vm12 = vweird.f32 %v2851_v43 }
 0x4f0   : > { %2852 = vrcp.f32 %v1315_v34  ;;  %v1752_v48 = vsel %vm1749_vm11, %v1751_v13, %v1747_v11  ;;  %vm1761_vm14 = vmor %vm1759_vm13, %vm1760_vm12  ;;  %v1780_v28 = vand.u32 2147483648, %v1315_v34  ;;  %v1778_v27 = vand.u32 2147483647, %v1315_v34  ;;  %v2105_v60 = vpop.f32.mrf.mxu0 }
 0x4f1   : > { %v1756_v52 = vsub.f32 1.0, %v1755_v56  ;;  %2346 = vst [vmem:[%s4094_s20 + $0x60] sm:$0xff] %v2314_v63  ;;  %v1753_v44 = vmul.f32 %v4166_v3, %v1752_v48  ;;  %vm1774_vm2 = vweird.f32 %v1315_v34 }
 0x4f2   : > { %v2209_v47 = vpop.f32.mrf.mxu2  ;;  %v1781_v20 = vor.u32 1.1754944e-38, %v1780_v28  ;;  %vm1779_vm4 = vcmp.eq.f32.partialorder %v1778_v27, 8.507059e+37 }
 0x4f3   : > { %v1757_v31 = vmul.f32 %v2851_v43, %v1756_v52  ;;  %v2210_v21 = vadd.f32 %v2209_v47, %v2096_v54  ;;  %2576 = vmatmul.msk.f32.gmra.mxu3 %vm1030_vm0, %v1753_v44 }
 0x4f5   : > { %v1758_v22 = vadd.f32 %v2851_v43, %v1757_v31  ;;  %v2283_v1 = vadd.f32 %v4082_v36, %v2210_v21 }
 0x4f6   : > { %v2853_v62 = vpop.eup %2852  ;;  %v1975_v59 = vpop.f32.mrf.mxu3 }
 0x4f7   : > { %v1318_v49 = vpop.xlane.xlu0 %1317  ;;  %v1770_v57 = vmul.f32 %v2853_v62, %v1315_v34  ;;  %v1762_v38 = vsel %vm1761_vm14, %v2851_v43, %v1758_v22  ;;  %v2315_v3 = vmax.f32 %v2283_v1, 0.0  ;;  %2232 = vmatmul.f32.gmra.mxu2 %v1975_v59  ;;  %vm1775_vm1 = vweird.f32 %v2853_v62 }
 0x4f8   : > { %2854 = vrcp.f32 %v1318_v49  ;;  %v1767_v53 = vsel %vm1764_vm15, %v1766_v45, %v1762_v38  ;;  %vm1776_vm3 = vmor %vm1774_vm2, %vm1775_vm1  ;;  %v1795_v30 = vand.u32 2147483648, %v1318_v49  ;;  %v1793_v18 = vand.u32 2147483647, %v1318_v49  ;;  %v2108_v33 = vpop.f32.mrf.mxu0 }
 0x4f9   : > { %v1771_v17 = vsub.f32 1.0, %v1770_v57  ;;  %2347 = vst [vmem:[%s4094_s20 + $0x68] sm:$0xff] %v2315_v3  ;;  %v1768_v5 = vmul.f32 %v4185_v16, %v1767_v53  ;;  %vm1789_vm6 = vweird.f32 %v1318_v49 }
 0x4fa   : > { %v2212_v24 = vpop.f32.mrf.mxu2  ;;  %v1796_v14 = vor.u32 1.1754944e-38, %v1795_v30  ;;  %vm1794_vm8 = vcmp.eq.f32.partialorder %v1793_v18, 8.507059e+37 }
 0x4fb   : > { %v1772_v39 = vmul.f32 %v2853_v62, %v1771_v17  ;;  %v2213_v35 = vadd.f32 %v2212_v24, %v2099_v8  ;;  %2577 = vmatmul.msk.f32.gmra.mxu3 %vm1030_vm0, %v1768_v5 }
 0x4fd   : > { %v1773_v29 = vadd.f32 %v2853_v62, %v1772_v39  ;;  %v2284_v41 = vadd.f32 %v4082_v36, %v2213_v35 }
 0x4fe   : > { %v2855_v46 = vpop.eup %2854  ;;  %v1978_v7 = vpop.f32.mrf.mxu3 }
 0x4ff   : > { %v1785_v42 = vmul.f32 %v2855_v46, %v1318_v49  ;;  %v1777_v23 = vsel %vm1776_vm3, %v2853_v62, %v1773_v29  ;;  %v2316_v16 = vmax.f32 %v2284_v41, 0.0  ;;  %vm1790_vm5 = vweird.f32 %v2855_v46  ;;  %2235 = vmatmul.f32.gmra.mxu2 %v1978_v7 }
 0x500   : > { %v1782_v0 = vsel %vm1779_vm4, %v1781_v20, %v1777_v23  ;;  %vm1791_vm7 = vmor %vm1789_vm6, %vm1790_vm5  ;;  %v2111_v56 = vpop.f32.mrf.mxu0 }
 0x501   : > { %v1786_v55 = vsub.f32 1.0, %v1785_v42  ;;  %2348 = vst [vmem:[%s4094_s20 + $0x70] sm:$0xff] %v2316_v16  ;;  %v1783_v61 = vmul.f32 %v4198_v26, %v1782_v0  ;;  %v2856_v16 = vld [vmem:[%s4315_s8] ss:$0 sm:$0xff] }
 0x502   : > { %v2215_v50 = vpop.f32.mrf.mxu2 }
 0x503   : > { %v1787_v51 = vmul.f32 %v2855_v46, %v1786_v55  ;;  %v2216_v15 = vadd.f32 %v2215_v50, %v2102_v2  ;;  %2578 = vmatmul.msk.f32.gmra.mxu3 %vm1030_vm0, %v1783_v61 }
 0x505   : > { %v1788_v12 = vadd.f32 %v2855_v46, %v1787_v51  ;;  %v2285_v6 = vadd.f32 %v4082_v36, %v2216_v15 }
 0x506   : > { %v1981_v9 = vpop.f32.mrf.mxu3 }
 0x507   : > { %v1792_v4 = vsel %vm1791_vm7, %v2855_v46, %v1788_v12  ;;  %v2317_v10 = vmax.f32 %v2285_v6, 0.0  ;;  %2238 = vmatmul.f32.gmra.mxu2 %v1981_v9 }
 0x508   : > { %v1797_v32 = vsel %vm1794_vm8, %v1796_v14, %v1792_v4  ;;  %v2114_v47 = vpop.f32.mrf.mxu0 }
 0x509   : > { %2349 = vst [vmem:[%s4094_s20 + $0x78] sm:$0xff] %v2317_v10  ;;  %v1798_v26 = vmul.f32 %v4208_v37, %v1797_v32 }
 0x50b   : > { %2579 = vmatmul.msk.f32.gmra.mxu3 %vm1030_vm0, %v1798_v26 }
 0x510   : > { %v2117_v22 = vpop.f32.mrf.mxu0 }
 0x518   : > { %v2120_v8 = vpop.f32.mrf.mxu0 }
 0x520   : > { %v2123_v24 = vpop.f32.mrf.mxu0 }
 0x528   : > { %v2126_v41 = vpop.f32.mrf.mxu0 }
 0x530   : > { %v2129_v51 = vpop.f32.mrf.mxu0 }
 0x552   : > { %v2218_v43 = vpop.f32.mrf.mxu2 }
 0x553   : > { %v2219_v54 = vadd.f32 %v2218_v43, %v2105_v60 }
 0x555   : > { %v2286_v25 = vadd.f32 %v4082_v36, %v2219_v54 }
 0x556   : > { %v1984_v34 = vpop.f32.mrf.mxu3 }
 0x557   : > { %v2318_v13 = vmax.f32 %v2286_v25, 0.0  ;;  %2241 = vmatmul.f32.gmra.mxu2 %v1984_v34 }
 0x559   : > { %2350 = vst [vmem:[%s4094_s20 + $0x80] sm:$0xff] %v2318_v13 }
 0x55a   : > { %v2221_v63 = vpop.f32.mrf.mxu2 }
 0x55b   : > { %v2222_v19 = vadd.f32 %v2221_v63, %v2108_v33 }
 0x55d   : > { %v2287_v11 = vadd.f32 %v4082_v36, %v2222_v19 }
 0x55e   : > { %v1987_v37 = vpop.f32.mrf.mxu3 }
 0x55f   : > { %2244 = vmatmul.f32.gmra.mxu2 %v1987_v37  ;;  %v2319_v52 = vmax.f32 %v2287_v11, 0.0 }
 0x561   : > { %2351 = vst [vmem:[%s4094_s20 + $0x88] sm:$0xff] %v2319_v52 }
 0x562   : > { %v2224_v48 = vpop.f32.mrf.mxu2 }
 0x563   : > { %v2225_v40 = vadd.f32 %v2224_v48, %v2111_v56 }
 0x565   : > { %v2288_v44 = vadd.f32 %v4082_v36, %v2225_v40 }
 0x566   : > { %v1990_v31 = vpop.f32.mrf.mxu3 }
 0x567   : > { %2247 = vmatmul.f32.gmra.mxu2 %v1990_v31  ;;  %v2320_v58 = vmax.f32 %v2288_v44, 0.0 }
 0x569   : > { %2352 = vst [vmem:[%s4094_s20 + $0x90] sm:$0xff] %v2320_v58 }
 0x56a   : > { %v2227_v21 = vpop.f32.mrf.mxu2 }
 0x56b   : > { %v2228_v62 = vadd.f32 %v2227_v21, %v2114_v47 }
 0x56d   : > { %v2289_v1 = vadd.f32 %v4082_v36, %v2228_v62 }
 0x56e   : > { %v1993_v45 = vpop.f32.mrf.mxu3 }
 0x56f   : > { %v2321_v49 = vmax.f32 %v2289_v1, 0.0  ;;  %2250 = vmatmul.f32.gmra.mxu2 %v1993_v45 }
 0x571   : > { %2353 = vst [vmem:[%s4094_s20 + $0x98] sm:$0xff] %v2321_v49 }
 0x572   : > { %v2230_v57 = vpop.f32.mrf.mxu2 }
 0x573   : > { %v2231_v38 = vadd.f32 %v2230_v57, %v2117_v22 }
 0x575   : > { %v2290_v3 = vadd.f32 %v4082_v36, %v2231_v38 }
 0x576   : > { %v1996_v17 = vpop.f32.mrf.mxu3 }
 0x577   : > { %v2322_v59 = vmax.f32 %v2290_v3, 0.0  ;;  %2253 = vmatmul.f32.gmra.mxu2 %v1996_v17 }
 0x579   : > { %2354 = vst [vmem:[%s4094_s20 + $0xa0] sm:$0xff] %v2322_v59 }
 0x57a   : > { %v2233_v53 = vpop.f32.mrf.mxu2 }
 0x57b   : > { %v2234_v28 = vadd.f32 %v2233_v53, %v2120_v8 }
 0x57d   : > { %v2291_v5 = vadd.f32 %v4082_v36, %v2234_v28 }
 0x57e   : > { %v1999_v39 = vpop.f32.mrf.mxu3 }
 0x57f   : > { %v2323_v27 = vmax.f32 %v2291_v5, 0.0  ;;  %2256 = vmatmul.f32.gmra.mxu2 %v1999_v39 }
 0x581   : > { %2355 = vst [vmem:[%s4094_s20 + $0xa8] sm:$0xff] %v2323_v27 }
 0x582   : > { %v2236_v35 = vpop.f32.mrf.mxu2 }
 0x583   : > { %v2237_v46 = vadd.f32 %v2236_v35, %v2123_v24 }
 0x585   : > { %v2292_v29 = vadd.f32 %v4082_v36, %v2237_v46  ;;  %v2132_v36 = vpop.f32.mrf.mxu0 }
 0x586   : > { %v2002_v20 = vpop.f32.mrf.mxu3 }
 0x587   : > { %v2324_v42 = vmax.f32 %v2292_v29, 0.0  ;;  %2259 = vmatmul.f32.gmra.mxu2 %v2002_v20 }
 0x589   : > { %2356 = vst [vmem:[%s4094_s20 + $0xb0] sm:$0xff] %v2324_v42 }
 0x58a   : > { %v2239_v23 = vpop.f32.mrf.mxu2 }
 0x58b   : > { %v2240_v55 = vadd.f32 %v2239_v23, %v2126_v41 }
 0x58d   : > { %v2293_v0 = vadd.f32 %v2856_v16, %v2240_v55  ;;  %v2135_v15 = vpop.f32.mrf.mxu0 }
 0x58e   : > { %v2005_v30 = vpop.f32.mrf.mxu3 }
 0x58f   : > { %v2325_v7 = vmax.f32 %v2293_v0, 0.0  ;;  %2262 = vmatmul.f32.gmra.mxu2 %v2005_v30 }
 0x591   : > { %2357 = vst [vmem:[%s4094_s20 + $0xb8] sm:$0xff] %v2325_v7 }
 0x595   : > { %v2138_v9 = vpop.f32.mrf.mxu0 }
 0x59d   : > { %v2141_v54 = vpop.f32.mrf.mxu0 }
 0x5a5   : > { %v2144_v19 = vpop.f32.mrf.mxu0 }
 0x5ad   : > { %v2147_v47 = vpop.f32.mrf.mxu0 }
 0x5b5   : > { %v2150_v62 = vpop.f32.mrf.mxu0 }
 0x5da   : > { %v2242_v18 = vpop.f32.mrf.mxu2 }
 0x5db   : > { %v2243_v61 = vadd.f32 %v2242_v18, %v2129_v51 }
 0x5dd   : > { %v2294_v2 = vadd.f32 %v2856_v16, %v2243_v61 }
 0x5df   : > { %v2326_v50 = vmax.f32 %v2294_v2, 0.0 }
 0x5e1   : > { %2358 = vst [vmem:[%s4094_s20 + $0xc0] sm:$0xff] %v2326_v50 }
 0x5e2   : > { %v2245_v12 = vpop.f32.mrf.mxu2 }
 0x5e3   : > { %v2246_v14 = vadd.f32 %v2245_v12, %v2132_v36 }
 0x5e5   : > { %v2295_v4 = vadd.f32 %v2856_v16, %v2246_v14 }
 0x5e7   : > { %v2327_v6 = vmax.f32 %v2295_v4, 0.0 }
 0x5e9   : > { %2359 = vst [vmem:[%s4094_s20 + $0xc8] sm:$0xff] %v2327_v6 }
 0x5ea   : > { %v2248_v32 = vpop.f32.mrf.mxu2 }
 0x5eb   : > { %v2249_v10 = vadd.f32 %v2248_v32, %v2135_v15 }
 0x5ed   : > { %v2296_v26 = vadd.f32 %v2856_v16, %v2249_v10 }
 0x5ef   : > { %v2328_v60 = vmax.f32 %v2296_v26, 0.0 }
 0x5f1   : > { %2360 = vst [vmem:[%s4094_s20 + $0xd0] sm:$0xff] %v2328_v60 }
 0x5f2   : > { %v2251_v33 = vpop.f32.mrf.mxu2 }
 0x5f3   : > { %v2252_v43 = vadd.f32 %v2251_v33, %v2138_v9 }
 0x5f5   : > { %v2297_v25 = vadd.f32 %v2856_v16, %v2252_v43 }
 0x5f7   : > { %v2329_v34 = vmax.f32 %v2297_v25, 0.0 }
 0x5f9   : > { %2361 = vst [vmem:[%s4094_s20 + $0xd8] sm:$0xff] %v2329_v34 }
 0x5fa   : > { %v2254_v13 = vpop.f32.mrf.mxu2 }
 0x5fb   : > { %v2255_v56 = vadd.f32 %v2254_v13, %v2141_v54 }
 0x5fd   : > { %v2298_v63 = vadd.f32 %v2856_v16, %v2255_v56 }
 0x5ff   : > { %v2330_v11 = vmax.f32 %v2298_v63, 0.0 }
 0x601   : > { %2362 = vst [vmem:[%s4094_s20 + $0xe0] sm:$0xff] %v2330_v11 }
 0x602   : > { %v2257_v37 = vpop.f32.mrf.mxu2 }
 0x603   : > { %v2258_v52 = vadd.f32 %v2257_v37, %v2144_v19 }
 0x605   : > { %v2299_v48 = vadd.f32 %v2856_v16, %v2258_v52 }
 0x607   : > { %v2331_v40 = vmax.f32 %v2299_v48, 0.0 }
 0x609   : > { %2363 = vst [vmem:[%s4094_s20 + $0xe8] sm:$0xff] %v2331_v40 }
 0x60a   : > { %v2260_v44 = vpop.f32.mrf.mxu2 }
 0x60b   : > { %v2261_v31 = vadd.f32 %v2260_v44, %v2147_v47 }
 0x60d   : > { %v2300_v58 = vadd.f32 %v2856_v16, %v2261_v31 }
 0x60f   : > { %v2332_v21 = vmax.f32 %v2300_v58, 0.0 }
 0x611   : > { %2364 = vst [vmem:[%s4094_s20 + $0xf0] sm:$0xff] %v2332_v21 }
 0x612   : > { %v2263_v22 = vpop.f32.mrf.mxu2 }
 0x613   : > { %v2264_v1 = vadd.f32 %v2263_v22, %v2150_v62 }
 0x615   : > { %v2301_v49 = vadd.f32 %v2856_v16, %v2264_v1 }
 0x617   : > { %v2333_v45 = vmax.f32 %v2301_v49, 0.0 }
 0x619   : > { %2365 = vst [vmem:[%s4094_s20 + $0xf8] sm:$0xff] %v2333_v45 }
 0x61a   : > { %3094 = shalt.err (!%p3091_p8)
}
 0x61b   : > { %s3158_s3 = smov 128   ;;  %s3159_s13 = smov 8  }
 0x61c   : > { %2644 = dma.vmem_to_hbm [thread:$0]  (%p3315_p0), %s2380_s29, 4096, %s2382_s18, %s2367_s24, %s3158_s3, %s3158_s3, %s3159_s13  }
 0x61d PF: > { %s2396_s26 = sand.u32 1, %s3137_s30   ;;  %p4370_p10 = scmp.ge.s32.totalorder %s3149_s12, 2 }
 0x61e   : > { %s2397_s7 = scalar_lea.sflag [#allocation4], %s2396_s26 }
 0x61f   : > { %p2670_p11 = pnand %p4370_p10, %p3323_p6 }
 0x621   : > { %p2671_p12 = pneg %p2670_p11 }
 0x623   : > { %3132 = dma.done.wait (%p2671_p12), %s2397_s7, 4096  }
 0x624   : > { %3134 = vsyncadd (%p2671_p12), %s2397_s7, 4294963200  ;;  %s4371_s12 = sld [smem:[#allocation22_spill]]  ;;  %s4374_s30 = smov %s3141_s10 }
 0x625   : > { %s4372_s20 = sld [smem:[#allocation21_spill]] }
 0x626   : > { %s4373_s11 = sld [smem:[#allocation23_spill]] }
 0x62a   : > { %p27_p2 = scmp.ge.s32.totalorder %s4371_s12, 4  }
 0x62b   : > { %s4375_s10 = smov %s4372_s20 }
 0x62c   :  { %29 = sbr.rel (!%p27_p2) target bundleno = 15 (0xf), region = 134 }
 0x631   :  { %2403 = vsyncpa [#allocation3], 1 }
 0x632   :  { %2405 = vsyncpa [#allocation3 + $0x1], 1 }
 0x633   :  { %2406 = vsyncpa [#allocation6], 1 }
 0x634   :  { %2408 = vsyncpa [#allocation6 + $0x1], 1 }
 0x635   :  { %2409 = vsyncpa [#allocation9], 1 }
 0x636   :  { %2410 = vsyncpa [#allocation12], 1 }
 0x637   :  { %2411 = vsyncpa [#allocation4], 1 }
 0x638   :  { %2413 = vsyncpa [#allocation4 + $0x1], 1 }

</bundles_post_ra>
